<compile_context>
chip_gen: v6e
topology: v6e:2x2x1
jax: 0.10.0
libtpu: 0.0.40
codegen_flags: <defaults>
</compile_context>

<pallas_src>
import jax
import jax.numpy as jnp
from jax.experimental import pallas as pl
from jax.experimental.pallas import tpu as pltpu


# ----------------------------------------------------------------------------
# Fused kernel (one batch tile of row-stacked images per grid step)
# ----------------------------------------------------------------------------
def _make_kernel(rows_per_image):
    """rows_per_image = upsampled image height H2; used to zero the dy-halo
    row at every image boundary inside a row-stacked batch tile."""
    f32, bf16 = jnp.float32, jnp.bfloat16

    def kernel(x_ref, uh_ref, wb0_ref, wb12_ref, wsc_ref, bias_ref, out_ref):
        # (1) nearest x2 upsample, rows only (the W duplication is folded into
        #     wb0 wrapper-side): one tiny matmul against an exact 0/1 matrix.
        xu = jnp.dot(uh_ref[...], x_ref[...], preferred_element_type=f32)

        nrows = xu.shape[0]
        row_in_img = (jax.lax.broadcasted_iota(jnp.int32, (nrows, 1), 0)
                      % rows_per_image)

        def conv3x3_bn(a, w_of_dy, bias, relu):
            # "same" 3x3 conv + folded BN in the (rows, W*C) layout:
            #   dy shift -> XLU sublane roll + boundary-row mask (no matmul),
            #   dx taps + W zero-padding -> block-banded bf16 weights (MXU),
            #   BN scale baked into the weights, bias/ReLU on the VPU.
            acc = None
            for dy in range(3):
                if dy == 1:
                    a_dy = a
                else:
                    rolled = pltpu.roll(a, shift=(1 - dy) % nrows, axis=0)
                    edge = 0 if dy == 0 else rows_per_image - 1
                    a_dy = jnp.where(row_in_img == edge, 0.0, rolled)
                term = jnp.dot(a_dy.astype(bf16), w_of_dy(dy),
                               preferred_element_type=f32)
                acc = term if acc is None else acc + term   # init from 1st product
            acc = acc + bias
            return jnp.maximum(acc, 0.0) if relu else acc

        b = bias_ref[...]                                    # (4, W2*Cout) f32
        h = conv3x3_bn(xu, lambda dy: wb0_ref[dy], b[0:1], relu=True)       # model0
        y = conv3x3_bn(h, lambda dy: wb12_ref[0, dy], b[1:2], relu=True)    # res conv1
        main = conv3x3_bn(y, lambda dy: wb12_ref[1, dy], b[2:3], relu=False)  # res conv2
        sc = jnp.dot(h.astype(bf16), wsc_ref[...],
                     preferred_element_type=f32) + b[3:4]                    # 1x1 shortcut
        out_ref[...] = jnp.maximum(main + sc, 0.0).astype(out_ref.dtype)

    return kernel


# ----------------------------------------------------------------------------
# Structured-parameter construction (one-time, hoisted out of the forward)
# ----------------------------------------------------------------------------
def _upsample_matrix(n):
    """(2n, n) 0/1 matrix: output row p reads input row p // 2."""
    p = jnp.arange(2 * n)[:, None]
    i = jnp.arange(n)[None, :]
    return (i == p // 2).astype(jnp.float32)


def _band_matrices(w, scale, width):
    """Block-banded matrices realizing the dx taps of a 'same' 3x3 conv.

    w: (3, 3, Ci, Co) HWIO weights; scale: folded-BN per-output-channel scale.
    Returns (3, width*Ci, width*Co): entry [dy, (j+dx-1)*Ci + c, j*Co + co] is
    w[dy, dx, c, co] * scale[co]; out-of-range j+dx-1 dropped == zero padding.
    """
    _, _, ci, co = w.shape
    ws = w * scale.reshape(1, 1, 1, co)
    mats = []
    for dy in range(3):
        m = jnp.zeros((width * ci, width * co), jnp.float32)
        for dx in range(3):
            m = m + jnp.kron(jnp.eye(width, k=1 - dx, dtype=jnp.float32),
                             ws[dy, dx])
        mats.append(m)
    return jnp.stack(mats)


def build_unet_up_block(p, n_batch, h, w, batch_tile=None):
    """Builds kernel-ready structured parameters ONCE and returns a jitted
    forward function x_nchw -> out_nchw."""
    cin, cout = p["w0"].shape[2], p["w0"].shape[3]
    h2, w2 = 2 * h, 2 * w
    if batch_tile is None:
        batch_tile = n_batch // 2 if (n_batch % 2 == 0 and n_batch >= 2) else 1
    assert n_batch % batch_tile == 0
    n_steps = n_batch // batch_tile
    rows_in, rows_out = batch_tile * h, batch_tile * h2
    wc_in, wc_out = w * cin, w2 * cout
    assert n_steps == 1 or (rows_in % 8 == 0 and rows_out % 8 == 0)

    f32, bf16 = jnp.float32, jnp.bfloat16

    # --- structured parameters (folded inference-mode BN baked in) ----------
    uh = jnp.kron(jnp.eye(batch_tile, dtype=f32), _upsample_matrix(h))
    uw = jnp.kron(_upsample_matrix(w).T, jnp.eye(cin, dtype=f32))
    band0 = _band_matrices(p["w0"], p["s0"], w2)                 # (3, w2*cin, wc_out)
    wb0 = jnp.einsum("ij,djk->dik", uw, band0)                   # (3, wc_in, wc_out)
    wb12 = jnp.stack([_band_matrices(p["w1"], p["s1"], w2),
                      _band_matrices(p["w2"], p["s2"], w2)])     # (2, 3, wc_out, wc_out)
    wsc = jnp.kron(jnp.eye(w2, dtype=f32),
                   p["wsc"] * p["ssc"].reshape(1, cout))         # (wc_out, wc_out)
    bias = jnp.concatenate(
        [jnp.tile(p[k].reshape(1, cout), (1, w2))
         for k in ("b0", "b1", "b2", "bsc")], axis=0)            # (4, wc_out)
    uh = uh.astype(bf16)        # exact: 0/1 entries
    wb0 = wb0.astype(bf16)
    wb12 = wb12.astype(bf16)
    wsc = wsc.astype(bf16)
    bias = bias.astype(f32)

    kernel = _make_kernel(h2)

    def full_spec(a):
        nd = a.ndim
        return pl.BlockSpec(tuple(a.shape), lambda g: (0,) * nd)

    # Advisory cost model for the XLA scheduler.
    flops = 2 * n_steps * (rows_out * rows_in * wc_in
                           + 3 * rows_out * wc_in * wc_out
                           + 7 * rows_out * wc_out * wc_out)
    weight_bytes = (2 * int(uh.size + wb0.size + wb12.size + wsc.size)
                    + 4 * int(bias.size))
    io_bytes = 2 * n_batch * h * wc_in + 4 * n_batch * h2 * wc_out
    # Explicit scoped-VMEM limit (v5e default is only 16 MiB; stay <= v7x 64 MiB).
    resident = (2 * weight_bytes + 2 * (2 * rows_in * wc_in)
                + 2 * (4 * rows_out * wc_out))
    vmem_limit = int(min(64 * 2**20, max(16 * 2**20, 8 * resident)))

    fused = pl.pallas_call(
        kernel,
        out_shape=jax.ShapeDtypeStruct((n_batch * h2, wc_out), f32),
        grid=(n_steps,),
        in_specs=[pl.BlockSpec((rows_in, wc_in), lambda g: (g, 0)),
                  full_spec(uh), full_spec(wb0), full_spec(wb12),
                  full_spec(wsc), full_spec(bias)],
        out_specs=pl.BlockSpec((rows_out, wc_out), lambda g: (g, 0)),
        compiler_params=pltpu.CompilerParams(
            dimension_semantics=("parallel",),
            vmem_limit_bytes=vmem_limit),
        cost_estimate=pl.CostEstimate(flops=flops, transcendentals=0,
                                      bytes_accessed=weight_bytes + io_bytes),
    )

    @jax.jit
    def _forward(x_nchw, uh_, wb0_, wb12_, wsc_, bias_):
        # NCHW -> lane-dense row-stacked (N*H, W*Cin) bf16.
        x_f = (jnp.transpose(x_nchw, (0, 2, 3, 1))
               .reshape(n_batch * h, wc_in).astype(bf16))
        out_f = fused(x_f, uh_, wb0_, wb12_, wsc_, bias_)
        out = out_f.reshape(n_batch, h2, w2, cout)
        return jnp.transpose(out, (0, 3, 1, 2)).astype(x_nchw.dtype)

    return lambda x_nchw: _forward(x_nchw, uh, wb0, wb12, wsc, bias)


# ----------------------------------------------------------------------------
# Parameter construction (deterministic, synthetic)
# ----------------------------------------------------------------------------
def _fold_bn(gamma, beta, mean, var, conv_bias, eps=1e-5):
    scale = gamma / jnp.sqrt(var + eps)
    bias = beta + (conv_bias - mean) * scale
    return scale.reshape(1, -1), bias.reshape(1, -1)


def make_params(key, cin, cout):
    ks = jax.random.split(key, 16)

    def conv_w(k, kh, kw, ci, co):
        return 0.1 * jax.random.normal(k, (kh, kw, ci, co), jnp.float32)

    def bn(k, c):
        k1, k2, k3, k4 = jax.random.split(k, 4)
        gamma = 1.0 + 0.1 * jax.random.normal(k1, (c,), jnp.float32)
        beta = 0.1 * jax.random.normal(k2, (c,), jnp.float32)
        mean = 0.1 * jax.random.normal(k3, (c,), jnp.float32)
        var = 1.0 + 0.1 * jax.random.uniform(k4, (c,), jnp.float32)
        return gamma, beta, mean, var

    p = {}
    # model0: upsample -> conv3x3(cin->cout) -> BN -> ReLU
    p["w0"] = conv_w(ks[0], 3, 3, cin, cout)
    cb0 = 0.1 * jax.random.normal(ks[1], (cout,), jnp.float32)
    p["s0"], p["b0"] = _fold_bn(*bn(ks[2], cout), cb0)
    # residual main conv1: conv3x3(cout->cout) -> BN -> ReLU
    p["w1"] = conv_w(ks[3], 3, 3, cout, cout)
    cb1 = 0.1 * jax.random.normal(ks[4], (cout,), jnp.float32)
    p["s1"], p["b1"] = _fold_bn(*bn(ks[5], cout), cb1)
    # residual main conv2: conv3x3(cout->cout) -> BN
    p["w2"] = conv_w(ks[6], 3, 3, cout, cout)
    cb2 = 0.1 * jax.random.normal(ks[7], (cout,), jnp.float32)
    p["s2"], p["b2"] = _fold_bn(*bn(ks[8], cout), cb2)
    # residual shortcut: conv1x1(cout->cout) -> BN
    p["wsc"] = conv_w(ks[9], 1, 1, cout, cout)[0, 0]  # (cout, cout)
    cbsc = 0.1 * jax.random.normal(ks[10], (cout,), jnp.float32)
    p["ssc"], p["bsc"] = _fold_bn(*bn(ks[11], cout), cbsc)
    return p


# ----------------------------------------------------------------------------
# Pure-JAX reference (f32)
# ----------------------------------------------------------------------------
def _conv_ref(x, w, pad):
    return jax.lax.conv_general_dilated(
        x, w, window_strides=(1, 1), padding=[(pad, pad), (pad, pad)],
        dimension_numbers=("NHWC", "HWIO", "NHWC"))


def unet_up_block_ref(x_nchw, p):
    x = jnp.transpose(x_nchw, (0, 2, 3, 1))
    x = jnp.repeat(jnp.repeat(x, 2, axis=1), 2, axis=2)
    h = jax.nn.relu(_conv_ref(x, p["w0"], 1) * p["s0"] + p["b0"])
    y = jax.nn.relu(_conv_ref(h, p["w1"], 1) * p["s1"] + p["b1"])
    main = _conv_ref(y, p["w2"], 1) * p["s2"] + p["b2"]
    sc = _conv_ref(h, p["wsc"][None, None], 0) * p["ssc"] + p["bsc"]
    out = jax.nn.relu(main + sc)
    return jnp.transpose(out, (0, 3, 1, 2))


# ----------------------------------------------------------------------------
if __name__ == "__main__":
    key = jax.random.PRNGKey(0)
    kx, kp = jax.random.split(key)

    N, Cin, Cout, H, W = 2, 4, 8, 16, 16
    x = jax.random.normal(kx, (N, Cin, H, W), jnp.float32)   # NCHW like PyTorch
    params = make_params(kp, Cin, Cout)

    forward = build_unet_up_block(params, n_batch=N, h=H, w=W)
    out = jax.block_until_ready(forward(x))
    ref = jax.block_until_ready(unet_up_block_ref(x, params))

    assert out.shape == (N, Cout, 2 * H, 2 * W), out.shape
    max_err = float(jnp.max(jnp.abs(out - ref)))
    # bf16 MXU operands -> looser tolerance than the all-f32 reference.
    assert jnp.allclose(out, ref, atol=5e-2, rtol=5e-2), max_err
    print("KERNEL_OK")
</pallas_src>

<mosaic_0001>
module attributes {stable_mosaic.version = 11 : i64} {
  func.func @kernel(%arg0: i32, %arg1: memref<16x64xbf16, #tpu.memory_space<vmem>>, %arg2: memref<32x16xbf16, #tpu.memory_space<vmem>>, %arg3: memref<3x64x256xbf16, #tpu.memory_space<vmem>>, %arg4: memref<2x3x256x256xbf16, #tpu.memory_space<vmem>>, %arg5: memref<256x256xbf16, #tpu.memory_space<vmem>>, %arg6: memref<4x256xf32, #tpu.memory_space<vmem>>, %arg7: memref<32x256xf32, #tpu.memory_space<vmem>>) attributes {dimension_semantics = [#tpu.dimension_semantics<parallel>], iteration_bounds = array<i64: 2>, scalar_prefetch = 0 : i64, scratch_operands = 0 : i64, tpu.core_type = #tpu.core_type<tc>, window_params = [{transform_indices = @transform_0, window_bounds = array<i64: 16, 64>}, {pipeline_mode = #tpu.pipeline_mode<synchronous>, transform_indices = @transform_1, window_bounds = array<i64: 32, 16>}, {pipeline_mode = #tpu.pipeline_mode<synchronous>, transform_indices = @transform_2, window_bounds = array<i64: 3, 64, 256>}, {pipeline_mode = #tpu.pipeline_mode<synchronous>, transform_indices = @transform_3, window_bounds = array<i64: 2, 3, 256, 256>}, {pipeline_mode = #tpu.pipeline_mode<synchronous>, transform_indices = @transform_4, window_bounds = array<i64: 256, 256>}, {pipeline_mode = #tpu.pipeline_mode<synchronous>, transform_indices = @transform_5, window_bounds = array<i64: 4, 256>}, {transform_indices = @transform_6, window_bounds = array<i64: 32, 256>}]} {
    %c0 = arith.constant 0 : index
    %c0_0 = arith.constant 0 : index
    %0 = vector.load %arg2[%c0, %c0_0] : memref<32x16xbf16, #tpu.memory_space<vmem>>, vector<32x16xbf16>
    %c0_1 = arith.constant 0 : index
    %c0_2 = arith.constant 0 : index
    %1 = vector.load %arg1[%c0_1, %c0_2] : memref<16x64xbf16, #tpu.memory_space<vmem>>, vector<16x64xbf16>
    %cst = arith.constant dense<0.000000e+00> : vector<32x64xf32>
    %2 = tpu.matmul %0, %1, %cst {dimension_numbers = #tpu.dot_dimension_numbers<[1], [0], [0], [1], [0, 0, 1, 1], [], []>} : vector<32x16xbf16>, vector<16x64xbf16>, vector<32x64xf32> -> vector<32x64xf32>
    %3 = tpu.iota {dimensions = array<i32: 0>} : vector<32x1xi32>
    %c32_i32 = arith.constant 32 : i32
    %c0_i32 = arith.constant 0 : i32
    %4 = arith.cmpi eq, %c32_i32, %c0_i32 : i32
    %c1_i32 = arith.constant 1 : i32
    %5 = arith.select %4, %c1_i32, %c32_i32 : i32
    %6 = vector.broadcast %5 : i32 to vector<32x1xi32>
    %7 = arith.remsi %3, %6 : vector<32x1xi32>
    %c0_i32_3 = arith.constant 0 : i32
    %8 = vector.broadcast %c0_i32_3 : i32 to vector<32x1xi32>
    %9 = arith.cmpi ne, %7, %8 : vector<32x1xi32>
    %c0_i32_4 = arith.constant 0 : i32
    %10 = vector.broadcast %c0_i32_4 : i32 to vector<32x1xi32>
    %11 = arith.cmpi slt, %7, %10 : vector<32x1xi32>
    %c0_i32_5 = arith.constant 0 : i32
    %12 = arith.cmpi slt, %5, %c0_i32_5 : i32
    %13 = vector.broadcast %12 : i1 to vector<32x1xi1>
    %14 = vector.broadcast %13 : vector<32x1xi1> to vector<32x1xi1>
    %15 = arith.xori %11, %14 : vector<32x1xi1>
    %16 = arith.andi %15, %9 : vector<32x1xi1>
    %17 = vector.broadcast %5 : i32 to vector<32x1xi32>
    %18 = arith.addi %7, %17 : vector<32x1xi32>
    %19 = arith.select %16, %18, %7 : vector<32x1xi1>, vector<32x1xi32>
    %c0_6 = arith.constant 0 : index
    %c0_7 = arith.constant 0 : index
    %20 = vector.load %arg6[%c0_6, %c0_7] : memref<4x256xf32, #tpu.memory_space<vmem>>, vector<4x256xf32>
    %21 = vector.extract_strided_slice %20 {offsets = [0, 0], sizes = [1, 256], strides = [1, 1]} : vector<4x256xf32> to vector<1x256xf32>
    %c1_i32_8 = arith.constant 1 : i32
    %22 = tpu.dynamic_rotate %2 by %c1_i32_8 dim 0 : vector<32x64xf32>, i32 -> vector<32x64xf32>
    %c0_i32_9 = arith.constant 0 : i32
    %23 = vector.broadcast %c0_i32_9 : i32 to vector<32x1xi32>
    %24 = arith.cmpi eq, %19, %23 : vector<32x1xi32>
    %cst_10 = arith.constant 0.000000e+00 : f32
    %25 = vector.shape_cast %24 : vector<32x1xi1> to vector<32x1xi1>
    %26 = vector.broadcast %25 : vector<32x1xi1> to vector<32x64xi1>
    %27 = vector.broadcast %cst_10 : f32 to vector<32x64xf32>
    %28 = arith.select %26, %27, %22 : vector<32x64xi1>, vector<32x64xf32>
    %29 = arith.truncf %28 : vector<32x64xf32> to vector<32x64xbf16>
    %c0_11 = arith.constant 0 : index
    %c0_12 = arith.constant 0 : index
    %c0_13 = arith.constant 0 : index
    %30 = vector.load %arg3[%c0_11, %c0_12, %c0_13] : memref<3x64x256xbf16, #tpu.memory_space<vmem>>, vector<1x64x256xbf16>
    %31 = vector.shape_cast %30 : vector<1x64x256xbf16> to vector<64x256xbf16>
    %cst_14 = arith.constant dense<0.000000e+00> : vector<32x256xf32>
    %32 = tpu.matmul %29, %31, %cst_14 {dimension_numbers = #tpu.dot_dimension_numbers<[1], [0], [0], [1], [0, 0, 1, 1], [], []>} : vector<32x64xbf16>, vector<64x256xbf16>, vector<32x256xf32> -> vector<32x256xf32>
    %33 = arith.truncf %2 : vector<32x64xf32> to vector<32x64xbf16>
    %c1 = arith.constant 1 : index
    %c0_15 = arith.constant 0 : index
    %c0_16 = arith.constant 0 : index
    %34 = vector.load %arg3[%c1, %c0_15, %c0_16] : memref<3x64x256xbf16, #tpu.memory_space<vmem>>, vector<1x64x256xbf16>
    %35 = vector.shape_cast %34 : vector<1x64x256xbf16> to vector<64x256xbf16>
    %cst_17 = arith.constant dense<0.000000e+00> : vector<32x256xf32>
    %36 = tpu.matmul %33, %35, %cst_17 {dimension_numbers = #tpu.dot_dimension_numbers<[1], [0], [0], [1], [0, 0, 1, 1], [], []>} : vector<32x64xbf16>, vector<64x256xbf16>, vector<32x256xf32> -> vector<32x256xf32>
    %37 = arith.addf %32, %36 : vector<32x256xf32>
    %c31_i32 = arith.constant 31 : i32
    %38 = tpu.dynamic_rotate %2 by %c31_i32 dim 0 : vector<32x64xf32>, i32 -> vector<32x64xf32>
    %c31_i32_18 = arith.constant 31 : i32
    %39 = vector.broadcast %c31_i32_18 : i32 to vector<32x1xi32>
    %40 = arith.cmpi eq, %19, %39 : vector<32x1xi32>
    %cst_19 = arith.constant 0.000000e+00 : f32
    %41 = vector.shape_cast %40 : vector<32x1xi1> to vector<32x1xi1>
    %42 = vector.broadcast %41 : vector<32x1xi1> to vector<32x64xi1>
    %43 = vector.broadcast %cst_19 : f32 to vector<32x64xf32>
    %44 = arith.select %42, %43, %38 : vector<32x64xi1>, vector<32x64xf32>
    %45 = arith.truncf %44 : vector<32x64xf32> to vector<32x64xbf16>
    %c2 = arith.constant 2 : index
    %c0_20 = arith.constant 0 : index
    %c0_21 = arith.constant 0 : index
    %46 = vector.load %arg3[%c2, %c0_20, %c0_21] : memref<3x64x256xbf16, #tpu.memory_space<vmem>>, vector<1x64x256xbf16>
    %47 = vector.shape_cast %46 : vector<1x64x256xbf16> to vector<64x256xbf16>
    %cst_22 = arith.constant dense<0.000000e+00> : vector<32x256xf32>
    %48 = tpu.matmul %45, %47, %cst_22 {dimension_numbers = #tpu.dot_dimension_numbers<[1], [0], [0], [1], [0, 0, 1, 1], [], []>} : vector<32x64xbf16>, vector<64x256xbf16>, vector<32x256xf32> -> vector<32x256xf32>
    %49 = arith.addf %37, %48 : vector<32x256xf32>
    %50 = vector.broadcast %21 : vector<1x256xf32> to vector<32x256xf32>
    %51 = arith.addf %49, %50 : vector<32x256xf32>
    %cst_23 = arith.constant 0.000000e+00 : f32
    %52 = vector.broadcast %cst_23 : f32 to vector<32x256xf32>
    %53 = arith.maximumf %51, %52 : vector<32x256xf32>
    %54 = vector.extract_strided_slice %20 {offsets = [1, 0], sizes = [1, 256], strides = [1, 1]} : vector<4x256xf32> to vector<1x256xf32>
    %c1_i32_24 = arith.constant 1 : i32
    %55 = tpu.dynamic_rotate %53 by %c1_i32_24 dim 0 : vector<32x256xf32>, i32 -> vector<32x256xf32>
    %c0_i32_25 = arith.constant 0 : i32
    %56 = vector.broadcast %c0_i32_25 : i32 to vector<32x1xi32>
    %57 = arith.cmpi eq, %19, %56 : vector<32x1xi32>
    %cst_26 = arith.constant 0.000000e+00 : f32
    %58 = vector.shape_cast %57 : vector<32x1xi1> to vector<32x1xi1>
    %59 = vector.broadcast %58 : vector<32x1xi1> to vector<32x256xi1>
    %60 = vector.broadcast %cst_26 : f32 to vector<32x256xf32>
    %61 = arith.select %59, %60, %55 : vector<32x256xi1>, vector<32x256xf32>
    %62 = arith.truncf %61 : vector<32x256xf32> to vector<32x256xbf16>
    %c0_27 = arith.constant 0 : index
    %c0_28 = arith.constant 0 : index
    %c0_29 = arith.constant 0 : index
    %c0_30 = arith.constant 0 : index
    %63 = vector.load %arg4[%c0_27, %c0_28, %c0_29, %c0_30] : memref<2x3x256x256xbf16, #tpu.memory_space<vmem>>, vector<1x1x256x256xbf16>
    %64 = vector.shape_cast %63 : vector<1x1x256x256xbf16> to vector<256x256xbf16>
    %cst_31 = arith.constant dense<0.000000e+00> : vector<32x256xf32>
    %65 = tpu.matmul %62, %64, %cst_31 {dimension_numbers = #tpu.dot_dimension_numbers<[1], [0], [0], [1], [0, 0, 1, 1], [], []>} : vector<32x256xbf16>, vector<256x256xbf16>, vector<32x256xf32> -> vector<32x256xf32>
    %66 = arith.truncf %53 : vector<32x256xf32> to vector<32x256xbf16>
    %c0_32 = arith.constant 0 : index
    %c1_33 = arith.constant 1 : index
    %c0_34 = arith.constant 0 : index
    %c0_35 = arith.constant 0 : index
    %67 = vector.load %arg4[%c0_32, %c1_33, %c0_34, %c0_35] : memref<2x3x256x256xbf16, #tpu.memory_space<vmem>>, vector<1x1x256x256xbf16>
    %68 = vector.shape_cast %67 : vector<1x1x256x256xbf16> to vector<256x256xbf16>
    %cst_36 = arith.constant dense<0.000000e+00> : vector<32x256xf32>
    %69 = tpu.matmul %66, %68, %cst_36 {dimension_numbers = #tpu.dot_dimension_numbers<[1], [0], [0], [1], [0, 0, 1, 1], [], []>} : vector<32x256xbf16>, vector<256x256xbf16>, vector<32x256xf32> -> vector<32x256xf32>
    %70 = arith.addf %65, %69 : vector<32x256xf32>
    %c31_i32_37 = arith.constant 31 : i32
    %71 = tpu.dynamic_rotate %53 by %c31_i32_37 dim 0 : vector<32x256xf32>, i32 -> vector<32x256xf32>
    %c31_i32_38 = arith.constant 31 : i32
    %72 = vector.broadcast %c31_i32_38 : i32 to vector<32x1xi32>
    %73 = arith.cmpi eq, %19, %72 : vector<32x1xi32>
    %cst_39 = arith.constant 0.000000e+00 : f32
    %74 = vector.shape_cast %73 : vector<32x1xi1> to vector<32x1xi1>
    %75 = vector.broadcast %74 : vector<32x1xi1> to vector<32x256xi1>
    %76 = vector.broadcast %cst_39 : f32 to vector<32x256xf32>
    %77 = arith.select %75, %76, %71 : vector<32x256xi1>, vector<32x256xf32>
    %78 = arith.truncf %77 : vector<32x256xf32> to vector<32x256xbf16>
    %c0_40 = arith.constant 0 : index
    %c2_41 = arith.constant 2 : index
    %c0_42 = arith.constant 0 : index
    %c0_43 = arith.constant 0 : index
    %79 = vector.load %arg4[%c0_40, %c2_41, %c0_42, %c0_43] : memref<2x3x256x256xbf16, #tpu.memory_space<vmem>>, vector<1x1x256x256xbf16>
    %80 = vector.shape_cast %79 : vector<1x1x256x256xbf16> to vector<256x256xbf16>
    %cst_44 = arith.constant dense<0.000000e+00> : vector<32x256xf32>
    %81 = tpu.matmul %78, %80, %cst_44 {dimension_numbers = #tpu.dot_dimension_numbers<[1], [0], [0], [1], [0, 0, 1, 1], [], []>} : vector<32x256xbf16>, vector<256x256xbf16>, vector<32x256xf32> -> vector<32x256xf32>
    %82 = arith.addf %70, %81 : vector<32x256xf32>
    %83 = vector.broadcast %54 : vector<1x256xf32> to vector<32x256xf32>
    %84 = arith.addf %82, %83 : vector<32x256xf32>
    %cst_45 = arith.constant 0.000000e+00 : f32
    %85 = vector.broadcast %cst_45 : f32 to vector<32x256xf32>
    %86 = arith.maximumf %84, %85 : vector<32x256xf32>
    %87 = vector.extract_strided_slice %20 {offsets = [2, 0], sizes = [1, 256], strides = [1, 1]} : vector<4x256xf32> to vector<1x256xf32>
    %c1_i32_46 = arith.constant 1 : i32
    %88 = tpu.dynamic_rotate %86 by %c1_i32_46 dim 0 : vector<32x256xf32>, i32 -> vector<32x256xf32>
    %c0_i32_47 = arith.constant 0 : i32
    %89 = vector.broadcast %c0_i32_47 : i32 to vector<32x1xi32>
    %90 = arith.cmpi eq, %19, %89 : vector<32x1xi32>
    %cst_48 = arith.constant 0.000000e+00 : f32
    %91 = vector.shape_cast %90 : vector<32x1xi1> to vector<32x1xi1>
    %92 = vector.broadcast %91 : vector<32x1xi1> to vector<32x256xi1>
    %93 = vector.broadcast %cst_48 : f32 to vector<32x256xf32>
    %94 = arith.select %92, %93, %88 : vector<32x256xi1>, vector<32x256xf32>
    %95 = arith.truncf %94 : vector<32x256xf32> to vector<32x256xbf16>
    %c1_49 = arith.constant 1 : index
    %c0_50 = arith.constant 0 : index
    %c0_51 = arith.constant 0 : index
    %c0_52 = arith.constant 0 : index
    %96 = vector.load %arg4[%c1_49, %c0_50, %c0_51, %c0_52] : memref<2x3x256x256xbf16, #tpu.memory_space<vmem>>, vector<1x1x256x256xbf16>
    %97 = vector.shape_cast %96 : vector<1x1x256x256xbf16> to vector<256x256xbf16>
    %cst_53 = arith.constant dense<0.000000e+00> : vector<32x256xf32>
    %98 = tpu.matmul %95, %97, %cst_53 {dimension_numbers = #tpu.dot_dimension_numbers<[1], [0], [0], [1], [0, 0, 1, 1], [], []>} : vector<32x256xbf16>, vector<256x256xbf16>, vector<32x256xf32> -> vector<32x256xf32>
    %99 = arith.truncf %86 : vector<32x256xf32> to vector<32x256xbf16>
    %c1_54 = arith.constant 1 : index
    %c1_55 = arith.constant 1 : index
    %c0_56 = arith.constant 0 : index
    %c0_57 = arith.constant 0 : index
    %100 = vector.load %arg4[%c1_54, %c1_55, %c0_56, %c0_57] : memref<2x3x256x256xbf16, #tpu.memory_space<vmem>>, vector<1x1x256x256xbf16>
    %101 = vector.shape_cast %100 : vector<1x1x256x256xbf16> to vector<256x256xbf16>
    %cst_58 = arith.constant dense<0.000000e+00> : vector<32x256xf32>
    %102 = tpu.matmul %99, %101, %cst_58 {dimension_numbers = #tpu.dot_dimension_numbers<[1], [0], [0], [1], [0, 0, 1, 1], [], []>} : vector<32x256xbf16>, vector<256x256xbf16>, vector<32x256xf32> -> vector<32x256xf32>
    %103 = arith.addf %98, %102 : vector<32x256xf32>
    %c31_i32_59 = arith.constant 31 : i32
    %104 = tpu.dynamic_rotate %86 by %c31_i32_59 dim 0 : vector<32x256xf32>, i32 -> vector<32x256xf32>
    %c31_i32_60 = arith.constant 31 : i32
    %105 = vector.broadcast %c31_i32_60 : i32 to vector<32x1xi32>
    %106 = arith.cmpi eq, %19, %105 : vector<32x1xi32>
    %cst_61 = arith.constant 0.000000e+00 : f32
    %107 = vector.shape_cast %106 : vector<32x1xi1> to vector<32x1xi1>
    %108 = vector.broadcast %107 : vector<32x1xi1> to vector<32x256xi1>
    %109 = vector.broadcast %cst_61 : f32 to vector<32x256xf32>
    %110 = arith.select %108, %109, %104 : vector<32x256xi1>, vector<32x256xf32>
    %111 = arith.truncf %110 : vector<32x256xf32> to vector<32x256xbf16>
    %c1_62 = arith.constant 1 : index
    %c2_63 = arith.constant 2 : index
    %c0_64 = arith.constant 0 : index
    %c0_65 = arith.constant 0 : index
    %112 = vector.load %arg4[%c1_62, %c2_63, %c0_64, %c0_65] : memref<2x3x256x256xbf16, #tpu.memory_space<vmem>>, vector<1x1x256x256xbf16>
    %113 = vector.shape_cast %112 : vector<1x1x256x256xbf16> to vector<256x256xbf16>
    %cst_66 = arith.constant dense<0.000000e+00> : vector<32x256xf32>
    %114 = tpu.matmul %111, %113, %cst_66 {dimension_numbers = #tpu.dot_dimension_numbers<[1], [0], [0], [1], [0, 0, 1, 1], [], []>} : vector<32x256xbf16>, vector<256x256xbf16>, vector<32x256xf32> -> vector<32x256xf32>
    %115 = arith.addf %103, %114 : vector<32x256xf32>
    %116 = vector.broadcast %87 : vector<1x256xf32> to vector<32x256xf32>
    %117 = arith.addf %115, %116 : vector<32x256xf32>
    %118 = arith.truncf %53 : vector<32x256xf32> to vector<32x256xbf16>
    %c0_67 = arith.constant 0 : index
    %c0_68 = arith.constant 0 : index
    %119 = vector.load %arg5[%c0_67, %c0_68] : memref<256x256xbf16, #tpu.memory_space<vmem>>, vector<256x256xbf16>
    %cst_69 = arith.constant dense<0.000000e+00> : vector<32x256xf32>
    %120 = tpu.matmul %118, %119, %cst_69 {dimension_numbers = #tpu.dot_dimension_numbers<[1], [0], [0], [1], [0, 0, 1, 1], [], []>} : vector<32x256xbf16>, vector<256x256xbf16>, vector<32x256xf32> -> vector<32x256xf32>
    %121 = vector.extract_strided_slice %20 {offsets = [3, 0], sizes = [1, 256], strides = [1, 1]} : vector<4x256xf32> to vector<1x256xf32>
    %122 = vector.broadcast %121 : vector<1x256xf32> to vector<32x256xf32>
    %123 = arith.addf %120, %122 : vector<32x256xf32>
    %124 = arith.addf %117, %123 : vector<32x256xf32>
    %cst_70 = arith.constant 0.000000e+00 : f32
    %125 = vector.broadcast %cst_70 : f32 to vector<32x256xf32>
    %126 = arith.maximumf %124, %125 : vector<32x256xf32>
    %c0_71 = arith.constant 0 : index
    %c0_72 = arith.constant 0 : index
    %127 = vector.load %arg7[%c0_71, %c0_72] : memref<32x256xf32, #tpu.memory_space<vmem>>, vector<32x256xf32>
    tpu.vector_store %arg7[%c0_71, %c0_72], %126 {strides = array<i32>} : memref<32x256xf32, #tpu.memory_space<vmem>>, vector<32x256xf32>,
    return
  }
  func.func @transform_0(%arg0: i32) -> (i32, i32) {
    %c0_i32 = arith.constant 0 : i32
    %c0_i32_0 = arith.constant 0 : i32
    return %arg0, %c0_i32 : i32, i32
  }
  func.func @transform_1(%arg0: i32) -> (i32, i32) {
    %c0_i32 = arith.constant 0 : i32
    %c0_i32_0 = arith.constant 0 : i32
    %c0_i32_1 = arith.constant 0 : i32
    return %c0_i32, %c0_i32_0 : i32, i32
  }
  func.func @transform_2(%arg0: i32) -> (i32, i32, i32) {
    %c0_i32 = arith.constant 0 : i32
    %c0_i32_0 = arith.constant 0 : i32
    %c0_i32_1 = arith.constant 0 : i32
    %c0_i32_2 = arith.constant 0 : i32
    return %c0_i32, %c0_i32_0, %c0_i32_1 : i32, i32, i32
  }
  func.func @transform_3(%arg0: i32) -> (i32, i32, i32, i32) {
    %c0_i32 = arith.constant 0 : i32
    %c0_i32_0 = arith.constant 0 : i32
    %c0_i32_1 = arith.constant 0 : i32
    %c0_i32_2 = arith.constant 0 : i32
    %c0_i32_3 = arith.constant 0 : i32
    return %c0_i32, %c0_i32_0, %c0_i32_1, %c0_i32_2 : i32, i32, i32, i32
  }
  func.func @transform_4(%arg0: i32) -> (i32, i32) {
    %c0_i32 = arith.constant 0 : i32
    %c0_i32_0 = arith.constant 0 : i32
    %c0_i32_1 = arith.constant 0 : i32
    return %c0_i32, %c0_i32_0 : i32, i32
  }
  func.func @transform_5(%arg0: i32) -> (i32, i32) {
    %c0_i32 = arith.constant 0 : i32
    %c0_i32_0 = arith.constant 0 : i32
    %c0_i32_1 = arith.constant 0 : i32
    return %c0_i32, %c0_i32_0 : i32, i32
  }
  func.func @transform_6(%arg0: i32) -> (i32, i32) {
    %c0_i32 = arith.constant 0 : i32
    %c0_i32_0 = arith.constant 0 : i32
    return %arg0, %c0_i32 : i32, i32
  }
}

</mosaic_0001>

<bundles_post_ra>
// kernel: _forward.1
= control target key start
LH: loop header
LB: loop body
LE: loop exit
PB: predicated region body
PF: predicated region fallthrough
CT: control target
= control target key end

     0   :  { %11 = vsyncpa [#allocation3], 0  ;;  %s3664_s21 = smov 0   ;;  %s4169_s0 = inlined_call_operand.vmem [shape: bf16[32,64], index: 0, kind: input, shape index: {}]   ;;  %s4170_s1 = inlined_call_operand.vmem [shape: bf16[32,16], index: 1, kind: input, shape index: {}]   ;;  %s4171_s2 = inlined_call_operand.vmem [shape: bf16[3,64,256], index: 2, kind: input, shape index: {}]   ;;  %s4172_s3 = inlined_call_operand.hbm [shape: bf16[2,3,256,256], index: 3, kind: input, shape index: {}]   ;;  %s4173_s4 = inlined_call_operand.vmem [shape: bf16[256,256], index: 4, kind: input, shape index: {}]   ;;  %s4174_s5 = inlined_call_operand.vmem [shape: f32[4,256], index: 5, kind: input, shape index: {}]   ;;  %s4175_s6 = inlined_call_operand.vmem [shape: f32[64,256], index: 6, kind: output, shape index: {}]  }
   0x1 LB: > { %s3670_s22 = sadd.s32 4294967295, %s3622_s21   ;;  %p2858_p0 = scmp.ge.s32.totalorder %s3622_s21, 1  ;;  %s3622_s21 = sphi %s3664_s21, %s17_s21  }
   0x2   : > { %p179_p1 = scmp.lt.s32.totalorder %s3622_s21, 3  ;;  %s3624_s23 = smov [#allocation2]  }
   0x3   : > { %s197_s24 = sshll.u32 %s3624_s23, 4  ;;  %p3195_p3 = scmp.eq.s32.totalorder %s3670_s22, 0  ;;  %s198_s24 = int_to_ptr.vmem [resolvable:$true] %s197_s24 }
   0x4   : > { %p3674_p2 = pnand %p2858_p0, %p179_p1  ;;  %s3597_s26 = scalar_lea.vmem %s198_s24, 24576 }
   0x5   : > { %p3598_p7 = scmp.ne.s32.totalorder %s198_s24, %s3597_s26  ;;  %p3605_p10 = scmp.lt.s32.totalorder %s198_s24, %s198_s24 }
   0x6   : > { %p3191_p4 = pneg %p3674_p2  ;;  %p3606_p11 = scmp.lt.s32.totalorder %s3597_s26, %s3597_s26 }
   0x8   : > { %p3192_p5 = pnand %p3195_p3, %p3191_p4  ;;  %p3607_p12 = por %p3606_p11, %p3605_p10 }
   0xa   : > { %p3588_p6 = pneg %p3192_p5 }
   0xc   : > { %p3600_p8 = pnand %p3598_p7, %p3588_p6 }
   0xe   : > { %p3601_p9 = pneg %p3600_p8 }
  0x10   : > { %p3608_p13 = pnand %p3607_p12, %p3601_p9 }
  0x12   : > { %3611 = shalt.err (!%p3608_p13)
}
  0x13   : > { %s3625_s27 = smov 128   ;;  %s3626_s28 = smov 8  }
  0x14   : > { %3194 = dma.hbm_to_vmem [thread:$0]  (!%p3192_p5), %s4172_s3, 24576, %s198_s24, [#allocation3], %s3625_s27, %s3625_s27, %s3626_s28  }
  0x15   : > { %228 = sbr.rel (%p3674_p2) target bundleno = 1040 (0x410), region = 44 }
  0x1a   : > { %3617 = dma.done.wait (%p3195_p3), [#allocation3], 24576  }
  0x1b   : > { %3619 = vsyncadd (%p3195_p3), [#allocation3], 4294942720  ;;  %s2863_s7 = sshll.u32 %s3670_s22, 1  ;;  %vm295_vm0 = vcmask 130048   ;;  %v3211_v1 = vld [vmem:[%s4170_s1] sm:$0xff]   ;;  %v3212_v2 = vld [vmem:[%s4170_s1 + $0x8] sm:$0xff]   ;;  %v351_v27 = vlaneseq }
  0x1c   : > { %p260_p0 = scmp.lt.s32.totalorder %s2863_s7, 3  ;;  %3183 = vmatprep.mubr.msk.bf16.mxu1 %vm295_vm0, %v3211_v1  ;;  %v3213_v3 = vld [vmem:[%s4171_s2 + $0x70] ss:$8 sps:$4 sm:$0xff]   ;;  %v3215_v4 = vld [vmem:[%s4171_s2 + $0x74] ss:$8 sps:$4 sm:$0xff]   ;;  %v3627_v12 = vmov 0  }
  0x1d   : > { %v3216_v5 = vld [vmem:[%s4171_s2 + $0x60] ss:$8 sps:$4 sm:$0xff]   ;;  %v3218_v6 = vld [vmem:[%s4171_s2 + $0x64] ss:$8 sps:$4 sm:$0xff]   ;;  %v3221_v7 = vld [vmem:[%s4171_s2 + $0x54] ss:$8 sps:$4 sm:$0xff]  }
  0x1e   : > { %s4186_s7 = smov (!%p260_p0, %s2863_s7), 3  ;;  %v3219_v8 = vld [vmem:[%s4171_s2 + $0x50] ss:$8 sps:$4 sm:$0xff]   ;;  %v3224_v9 = vld [vmem:[%s4171_s2 + $0x44] ss:$8 sps:$4 sm:$0xff]   ;;  %vm491_vm1 = vcmask 523264  }
  0x1f   : > { %s2864_s8 = sshll.u32 %s4186_s7, 2  ;;  %v3222_v10 = vld [vmem:[%s4171_s2 + $0x40] ss:$8 sps:$4 sm:$0xff]   ;;  %v3227_v11 = vld [vmem:[%s4171_s2 + $0x34] ss:$8 sps:$4 sm:$0xff]   ;;  %v3751_v31 = vshrl.u32 %v351_v27, 7 }
  0x20   : > { %s263_s11 = scalar_lea.vmem %s4169_s0, %s2864_s8  ;;  %v3249_v13 = vld [vmem:[#allocation2 + $0x174] ss:$8 sps:$4 sm:$0xff]   ;;  %v3251_v14 = vld [vmem:[#allocation2 + $0x170] ss:$8 sps:$4 sm:$0xff]   ;;  %v3252_v15 = vld [vmem:[#allocation2 + $0x164] ss:$8 sps:$4 sm:$0xff]  }
  0x21   : > { %v3210_v0 = vld [vmem:[%s263_s11] sm:$0xff]   ;;  %1085 = vmatprep.subr.bf16.mxu0 %v3249_v13  ;;  %v3255_v17 = vld [vmem:[#allocation2 + $0x154] ss:$8 sps:$4 sm:$0xff]   ;;  %v3257_v18 = vld [vmem:[#allocation2 + $0x150] ss:$8 sps:$4 sm:$0xff]   ;;  %v360_v33 = vand.u32 31, %v3751_v31 }
  0x22   : > { %3181 = vmatprep.subr.bf16.mxu1 %v3210_v0  ;;  %1086 = vmatpush1.bf16.msra.mxu0 %v3251_v14  ;;  %v3254_v16 = vld [vmem:[#allocation2 + $0x160] ss:$8 sps:$4 sm:$0xff]   ;;  %v3258_v19 = vld [vmem:[#allocation2 + $0x144] ss:$8 sps:$4 sm:$0xff]   ;;  %v3264_v21 = vld [vmem:[#allocation2 + $0x134] ss:$8 sps:$4 sm:$0xff]  }
  0x23   : > { %3182 = vmatpush3.bf16.msra.mxu1 %v3210_v0  ;;  %1087 = vmatprep.subr.bf16.mxu0 %v3252_v15  ;;  %v3263_v20 = vld [vmem:[#allocation2 + $0x140] ss:$8 sps:$4 sm:$0xff]   ;;  %v3225_v26 = vld [vmem:[%s4171_s2 + $0x30] ss:$8 sps:$4 sm:$0xff]   ;;  %v3230_v29 = vld [vmem:[%s4171_s2 + $0x24] ss:$8 sps:$4 sm:$0xff]  }
  0x24   : > { %506 = vmatprep.subr.bf16.mxu1 %v3215_v4  ;;  %v3228_v30 = vld [vmem:[%s4171_s2 + $0x20] ss:$8 sps:$4 sm:$0xff]   ;;  %v3233_v32 = vld [vmem:[%s4171_s2 + $0x14] ss:$8 sps:$4 sm:$0xff]   ;;  %vm409_vm2 = vcmp.lt.s32.totalorder %v3751_v31, 1  ;;  %vm3771_vm3 = vcmp.eq.s32.totalorder %v360_v33, 0 }
  0x25   : > { %v3231_v35 = vld [vmem:[%s4171_s2 + $0x10] ss:$8 sps:$4 sm:$0xff]   ;;  %v3236_v38 = vld [vmem:[%s4171_s2 + $0x4] ss:$8 sps:$4 sm:$0xff]   ;;  %v3234_v42 = vld [vmem:[%s4171_s2] ss:$8 sps:$4 sm:$0xff]  }
  0x26   : > { %3184 = vmatmul.mubr.msk.bf16.vlgmr.msra.gmra.mxu1 %vm295_vm0, %v3212_v2  ;;  %1088 = vmatpush1.bf16.msra.mxu0 %v3254_v16  ;;  %v3239_v43 = vld [vmem:[%s4171_s2 + $0xb4] ss:$8 sps:$4 sm:$0xff]   ;;  %v3237_v46 = vld [vmem:[%s4171_s2 + $0xb0] ss:$8 sps:$4 sm:$0xff]   ;;  %v3242_v48 = vld [vmem:[%s4171_s2 + $0xa4] ss:$8 sps:$4 sm:$0xff]  }
  0x27   : > { %507 = vmatpush1.bf16.msra.mxu1 %v3213_v3  ;;  %530 = vmatprep.mubr.bf16.mxu1 %v3627_v12  ;;  %v3240_v50 = vld [vmem:[%s4171_s2 + $0xa0] ss:$8 sps:$4 sm:$0xff]   ;;  %v3245_v51 = vld [vmem:[%s4171_s2 + $0x94] ss:$8 sps:$4 sm:$0xff]   ;;  %v3243_v54 = vld [vmem:[%s4171_s2 + $0x90] ss:$8 sps:$4 sm:$0xff]  }
  0x28   : > { %508 = vmatprep.subr.bf16.mxu1 %v3218_v6  ;;  %1089 = vmatprep.subr.bf16.mxu0 %v3255_v17  ;;  %v3248_v56 = vld [vmem:[%s4171_s2 + $0x84] ss:$8 sps:$4 sm:$0xff]   ;;  %v355_v58 = vadd.s32 24, %v3751_v31  ;;  %v3246_v61 = vld [vmem:[%s4171_s2 + $0x80] ss:$8 sps:$4 sm:$0xff]   ;;  %vm654_vm4 = vcmp.lt.s32.totalorder %v3751_v31, 7  ;;  %vm2983_vm6 = vmneg %vm3771_vm3 }
  0x29   : > { %v3262_v62 = vld [vmem:[#allocation2 + $0x74] ss:$8 sps:$4 sm:$0xff]   ;;  %v3260_v3 = vld [vmem:[#allocation2 + $0x70] ss:$8 sps:$4 sm:$0xff]   ;;  %v3270_v14 = vld [vmem:[#allocation2 + $0x124] ss:$8 sps:$4 sm:$0xff]  }
  0x2a   : > { %1090 = vmatpush1.bf16.msra.mxu0 %v3257_v18  ;;  %v381_v2 = vand.u32 31, %v355_v58  ;;  %v3269_v13 = vld [vmem:[#allocation2 + $0x130] ss:$8 sps:$4 sm:$0xff]   ;;  %v3274_v16 = vld [vmem:[#allocation2 + $0x54] ss:$8 sps:$4 sm:$0xff]   ;;  %vm3628_vm7 = vmmov 1  }
  0x2b   : > { %509 = vmatpush1.bf16.msra.mxu1 %v3216_v5  ;;  %1091 = vmatprep.subr.bf16.mxu0 %v3258_v19  ;;  %v3268_v5 = vld [vmem:[#allocation2 + $0x64] ss:$8 sps:$4 sm:$0xff]   ;;  %v3272_v15 = vld [vmem:[#allocation2 + $0x50] ss:$8 sps:$4 sm:$0xff]   ;;  %v3276_v17 = vld [vmem:[#allocation2 + $0x114] ss:$8 sps:$4 sm:$0xff]  }
  0x2c   : > { %510 = vmatprep.subr.bf16.mxu1 %v3221_v7  ;;  %vm3830_vm5 = vcmp.eq.s32.totalorder %v381_v2, 31  ;;  %v3278_v18 = vld [vmem:[#allocation2 + $0x40] ss:$8 sps:$4 sm:$0xff]   ;;  %v3280_v19 = vld [vmem:[#allocation2 + $0x44] ss:$8 sps:$4 sm:$0xff]   ;;  %vm3906_vm8 = vmpackc.low %vm3628_vm7, %vm2983_vm6  ;;  %s2865_s20 = sshll.u32 %s3670_s22, 2 }
  0x2d   : > { %v3292_v27 = vld [vmem:[#allocation2 + $0x24] ss:$8 sps:$4 sm:$0xff]   ;;  %v3299_v33 = vld [vmem:[#allocation2 + $0x1e0] ss:$8 sps:$4 sm:$0xff]   ;;  %vm3023_vm9 = vmneg %vm3830_vm5  ;;  %p266_p1 = scmp.lt.s32.totalorder %s2865_s20, 7 }
  0x2e   : > { %1092 = vmatpush1.bf16.msra.mxu0 %v3263_v20  ;;  %v3281_v20 = vld [vmem:[#allocation2 + $0x110] ss:$8 sps:$4 sm:$0xff]   ;;  %v3335_v58 = vld [vmem:[#allocation2 + $0x180] ss:$8 sps:$4 sm:$0xff]   ;;  %vm3945_vm10 = vmpackc.low %vm3023_vm9, %vm3628_vm7 }
  0x2f   : > { %511 = vmatpush1.bf16.msra.mxu1 %v3219_v8  ;;  %1093 = vmatprep.subr.bf16.mxu0 %v3264_v21  ;;  %v3266_v8 = vld [vmem:[#allocation2 + $0x60] ss:$8 sps:$4 sm:$0xff]   ;;  %v3282_v21 = vld [vmem:[#allocation2 + $0x104] ss:$8 sps:$4 sm:$0xff]   ;;  %s4188_s20 = smov (!%p266_p1, %s2865_s20), 7 }
  0x30   : > { %512 = vmatprep.subr.bf16.mxu1 %v3224_v9  ;;  %s3177_s22 = sshll.u32 %s4188_s20, 4 }
  0x31   : > { %s4156_s27 = scalar_lea.vmem %s4175_s6, %s3177_s22 }
  0x32   : > { %1094 = vmatpush1.bf16.msra.mxu0 %v3269_v13 }
  0x33   : > { %513 = vmatpush1.bf16.msra.mxu1 %v3222_v10  ;;  %1095 = vmatprep.subr.bf16.mxu0 %v3270_v14 }
  0x34   : > { %605 = vmatprep.subr.bf16.mxu1 %v3227_v11 }
  0xe6   : > { %v3730_v22 = vpop.f32.mrf.mxu1 }
  0xe7   : > { %v407_v49 = vrot.slane %v3730_v22, 7  ;;  %v652_v59 = vrot.slane %v3730_v22, 1 }
  0xe8   : > { %v3732_v23 = vpop.f32.mrf.mxu1 }
  0xe9   : > { %v405_v36 = vrot.slane %v3732_v23, 7  ;;  %v650_v60 = vrot.slane %v3732_v23, 1 }
  0xea   : > { %v3734_v24 = vpop.f32.mrf.mxu1 }
  0xeb   : > { %v408_v34 = vrot.slane %v3734_v24, 7  ;;  %v441_v37 = vpack.c.bf16 %v3734_v24, %v3730_v22  ;;  %v653_v1 = vrot.slane %v3734_v24, 1  ;;  %v3284_v22 = vld [vmem:[#allocation2 + $0x30] ss:$8 sps:$4 sm:$0xff]   ;;  %v3287_v24 = vld [vmem:[#allocation2 + $0x100] ss:$8 sps:$4 sm:$0xff]  }
  0xec   : > { %v3736_v25 = vpop.f32.mrf.mxu1 }
  0xed   : > { %v440_v28 = vpack.c.bf16 %v3736_v25, %v3732_v23  ;;  %v406_v39 = vrot.slane %v3736_v25, 7  ;;  %v413_v40 = vsel %vm409_vm2, %v408_v34, %v405_v36  ;;  %v410_v53 = vsel %vm409_vm2, %v407_v49, %v408_v34  ;;  %v3286_v23 = vld [vmem:[#allocation2 + $0x34] ss:$8 sps:$4 sm:$0xff]  }
  0xee   : > { %v426_v44 = vsel %vm3771_vm3, 0.0, %v413_v40  ;;  %v651_v57 = vrot.slane %v3736_v25, 1  ;;  %v658_v6 = vsel %vm654_vm4, %v653_v1, %v650_v60  ;;  %v655_v9 = vsel %vm654_vm4, %v652_v59, %v653_v1  ;;  %v3288_v25 = vld [vmem:[#allocation2 + $0x1f4] ss:$8 sps:$4 sm:$0xff]   ;;  %v3350_v1 = vld [vmem:[#allocation2 + $0x84] ss:$8 sps:$4 sm:$0xff]  }
  0xef   : > { %2889 = vmatmul.mubr.msk.bf16.vlgmr.msra.gmra.mxu1 %vm491_vm1, %v440_v28  ;;  %v412_v45 = vsel %vm409_vm2, %v405_v36, %v406_v39  ;;  %v411_v52 = vsel %vm409_vm2, %v406_v39, %v407_v49  ;;  %v674_v10 = vsel %vm3830_vm5, 0.0, %v658_v6  ;;  %v3293_v28 = vld [vmem:[#allocation2 + $0x1f0] ss:$8 sps:$4 sm:$0xff]   ;;  %v3300_v34 = vld [vmem:[#allocation2 + $0x1d4] ss:$8 sps:$4 sm:$0xff]  }
  0xf0   : > { %606 = vmatpush1.bf16.msra.mxu1 %v3225_v26  ;;  %540 = vmatprep.mubr.bf16.mxu1 %v3627_v12  ;;  %v430_v47 = vpack.c.bf16 %v412_v45, %v426_v44  ;;  %v431_v55 = vpack.c.bf16 %v410_v53, %v411_v52  ;;  %v656_v63 = vsel %vm654_vm4, %v651_v57, %v652_v59  ;;  %v3290_v26 = vld [vmem:[#allocation2 + $0x20] ss:$8 sps:$4 sm:$0xff]   ;;  %v3304_v36 = vld [vmem:[#allocation2 + $0x4] ss:$8 sps:$4 sm:$0xff]   ;;  %v3308_v39 = vld [vmem:[#allocation2 + $0xf0] ss:$8 sps:$4 sm:$0xff]  }
  0xf1   : > { %607 = vmatprep.subr.bf16.mxu1 %v3230_v29  ;;  %v657_v0 = vsel %vm654_vm4, %v650_v60, %v651_v57  ;;  %v676_v11 = vpack.c.bf16 %v674_v10, %v655_v9  ;;  %v3294_v29 = vld [vmem:[#allocation2 + $0x1e4] ss:$8 sps:$4 sm:$0xff]   ;;  %v3310_v40 = vld [vmem:[#allocation2 + $0xf4] ss:$8 sps:$4 sm:$0xff]   ;;  %v3314_v44 = vld [vmem:[#allocation2 + $0xe0] ss:$8 sps:$4 sm:$0xff]  }
  0xf2   : > { %v675_v4 = vpack.c.bf16 %v656_v63, %v657_v0  ;;  %v3316_v45 = vld [vmem:[#allocation2 + $0xe4] ss:$8 sps:$4 sm:$0xff]   ;;  %v3320_v49 = vld [vmem:[#allocation2 + $0xd0] ss:$8 sps:$4 sm:$0xff]   ;;  %v3326_v53 = vld [vmem:[#allocation2 + $0xc0] ss:$8 sps:$4 sm:$0xff]  }
  0xf3   : > { %v3328_v52 = vld [vmem:[#allocation2 + $0xc4] ss:$8 sps:$4 sm:$0xff]   ;;  %v3332_v57 = vld [vmem:[#allocation2 + $0xb0] ss:$8 sps:$4 sm:$0xff]   ;;  %v3341_v60 = vld [vmem:[#allocation2 + $0x274] ss:$8 sps:$4 sm:$0xff]  }
  0xf4   : > { %608 = vmatpush1.bf16.msra.mxu1 %v3228_v30  ;;  %v3296_v30 = vld [vmem:[#allocation2 + $0x10] ss:$8 sps:$4 sm:$0xff]   ;;  %v3338_v59 = vld [vmem:[#allocation2 + $0xa4] ss:$8 sps:$4 sm:$0xff]   ;;  %v3348_v0 = vld [vmem:[#allocation2 + $0x80] ss:$8 sps:$4 sm:$0xff]  }
  0xf5   : > { %609 = vmatprep.subr.bf16.mxu1 %v3233_v32  ;;  %v3298_v32 = vld [vmem:[#allocation2 + $0x14] ss:$8 sps:$4 sm:$0xff]   ;;  %v3342_v63 = vld [vmem:[#allocation2 + $0x90] ss:$8 sps:$4 sm:$0xff]  }
  0xf7   : > { %2890 = vmatmul.mubr.msk.bf16.gmra.mxu1 %vm491_vm1, %v441_v37  ;;  %v3305_v37 = vld [vmem:[#allocation2 + $0x1d0] ss:$8 sps:$4 sm:$0xff]  }
  0xf8   : > { %610 = vmatpush1.bf16.msra.mxu1 %v3231_v35  ;;  %629 = vmatprep.mubr.bf16.mxu1 %v3627_v12  ;;  %v3302_v35 = vld [vmem:[#allocation2] ss:$8 sps:$4 sm:$0xff]  }
  0xf9   : > { %611 = vmatprep.subr.bf16.mxu1 %v3236_v38  ;;  %v3306_v38 = vld [vmem:[#allocation2 + $0x1c4] ss:$8 sps:$4 sm:$0xff]  }
  0xfc   : > { %612 = vmatpush1.bf16.msra.mxu1 %v3234_v42  ;;  %v3311_v42 = vld [vmem:[#allocation2 + $0x1c0] ss:$8 sps:$4 sm:$0xff]  }
  0xfd   : > { %740 = vmatprep.subr.bf16.mxu1 %v3239_v43  ;;  %v3312_v43 = vld [vmem:[#allocation2 + $0x1b4] ss:$8 sps:$4 sm:$0xff]  }
  0xff   : > { %2899 = vmatmul.mubr.msk.bf16.vlgmr.msra.gmra.mxu1 %vm491_vm1, %v430_v47  ;;  %v3318_v47 = vld [vmem:[#allocation2 + $0x1a4] ss:$8 sps:$4 sm:$0xff]  }
 0x100   : > { %741 = vmatpush1.bf16.msra.mxu1 %v3237_v46  ;;  %639 = vmatprep.mubr.bf16.mxu1 %v3627_v12  ;;  %v3317_v46 = vld [vmem:[#allocation2 + $0x1b0] ss:$8 sps:$4 sm:$0xff]  }
 0x101   : > { %742 = vmatprep.subr.bf16.mxu1 %v3242_v48  ;;  %v3322_v48 = vld [vmem:[#allocation2 + $0xd4] ss:$8 sps:$4 sm:$0xff]  }
 0x104   : > { %743 = vmatpush1.bf16.msra.mxu1 %v3240_v50  ;;  %v3323_v50 = vld [vmem:[#allocation2 + $0x1a0] ss:$8 sps:$4 sm:$0xff]  }
 0x105   : > { %744 = vmatprep.subr.bf16.mxu1 %v3245_v51  ;;  %v3324_v51 = vld [vmem:[#allocation2 + $0x194] ss:$8 sps:$4 sm:$0xff]  }
 0x107   : > { %2900 = vmatmul.mubr.msk.bf16.gmra.mxu1 %vm491_vm1, %v431_v55  ;;  %v3330_v55 = vld [vmem:[#allocation2 + $0x184] ss:$8 sps:$4 sm:$0xff]  }
 0x108   : > { %745 = vmatpush1.bf16.msra.mxu1 %v3243_v54  ;;  %764 = vmatprep.mubr.bf16.mxu1 %v3627_v12  ;;  %v3329_v54 = vld [vmem:[#allocation2 + $0x190] ss:$8 sps:$4 sm:$0xff]  }
 0x109   : > { %746 = vmatprep.subr.bf16.mxu1 %v3248_v56  ;;  %v3334_v56 = vld [vmem:[#allocation2 + $0xb4] ss:$8 sps:$4 sm:$0xff]  }
 0x10c   : > { %747 = vmatpush1.bf16.msra.mxu1 %v3246_v61  ;;  %v3336_v61 = vld [vmem:[#allocation2 + $0xa0] ss:$8 sps:$4 sm:$0xff]  }
 0x10d   : > { %1298 = vmatprep.subr.bf16.mxu1 %v3262_v62  ;;  %v3344_v62 = vld [vmem:[#allocation2 + $0x94] ss:$8 sps:$4 sm:$0xff]  }
 0x10f   : > { %2917 = vmatmul.mubr.msk.bf16.vlgmr.msra.gmra.mxu1 %vm491_vm1, %v675_v4 }
 0x110   : > { %774 = vmatprep.mubr.bf16.mxu1 %v3627_v12  ;;  %1299 = vmatpush1.bf16.msra.mxu1 %v3260_v3  ;;  %v3275_v12 = vld [vmem:[#allocation2 + $0x120] ss:$8 sps:$4 sm:$0xff]  }
 0x111   : > { %1300 = vmatprep.subr.bf16.mxu1 %v3268_v5  ;;  %1096 = vmatpush1.bf16.msra.mxu0 %v3275_v12 }
 0x112   : > { %1097 = vmatprep.subr.bf16.mxu0 %v3276_v17 }
 0x114   : > { %1301 = vmatpush1.bf16.msra.mxu1 %v3266_v8 }
 0x115   : > { %1302 = vmatprep.subr.bf16.mxu1 %v3274_v16  ;;  %1098 = vmatpush1.bf16.msra.mxu0 %v3281_v20 }
 0x116   : > { %1099 = vmatprep.subr.bf16.mxu0 %v3282_v21  ;;  %v3845_v21 = vld [vmem:[%s4174_s5] sm:$0xff] }
 0x117   : > { %2918 = vmatmul.mubr.msk.bf16.gmra.mxu1 %vm491_vm1, %v676_v11 }
 0x118   : > { %1303 = vmatpush1.bf16.msra.mxu1 %v3272_v15 }
 0x119   : > { %1304 = vmatprep.subr.bf16.mxu1 %v3280_v19  ;;  %1100 = vmatpush1.bf16.msra.mxu0 %v3287_v24  ;;  %v796_v19 = vsub.s32 0, %v3751_v31 }
 0x11a   : > { %1101 = vmatprep.subr.bf16.mxu0 %v3288_v25 }
 0x11b   : > { %v797_v24 = vrot.slane %v3845_v21, %v796_v19 }
 0x11c   : > { %1305 = vmatpush1.bf16.msra.mxu1 %v3278_v18  ;;  %v800_v18 = vsub.s32 4, %v3751_v31 }
 0x11d   : > { %1306 = vmatprep.subr.bf16.mxu1 %v3286_v23  ;;  %1102 = vmatpush2.bf16.msra.mxu0 %v3293_v28 }
 0x11e   : > { %1103 = vmatprep.subr.bf16.mxu0 %v3294_v29  ;;  %v801_v23 = vrot.slane %v3845_v21, %v800_v18 }
 0x120   : > { %1307 = vmatpush1.bf16.msra.mxu1 %v3284_v22 }
 0x121   : > { %1308 = vmatprep.subr.bf16.mxu1 %v3292_v27  ;;  %1104 = vmatpush2.bf16.msra.mxu0 %v3299_v33 }
 0x122   : > { %1105 = vmatprep.subr.bf16.mxu0 %v3300_v34  ;;  %v807_v34 = vrot.slane %v797_v24, %v796_v19  ;;  %v3351_v24 = vld [vmem:[#allocation2 + $0x250] ss:$8 sps:$4 sm:$0xff]  }
 0x124   : > { %1309 = vmatpush1.bf16.msra.mxu1 %v3290_v26 }
 0x125   : > { %1310 = vmatprep.subr.bf16.mxu1 %v3298_v32  ;;  %1106 = vmatpush2.bf16.msra.mxu0 %v3305_v37 }
 0x126   : > { %1107 = vmatprep.subr.bf16.mxu0 %v3306_v38 }
 0x128   : > { %1311 = vmatpush1.bf16.msra.mxu1 %v3296_v30  ;;  %v811_v30 = vrot.slane %v801_v23, %v796_v19 }
 0x129   : > { %1312 = vmatprep.subr.bf16.mxu1 %v3304_v36  ;;  %1108 = vmatpush2.bf16.msra.mxu0 %v3311_v42 }
 0x12a   : > { %1109 = vmatprep.subr.bf16.mxu0 %v3312_v43 }
 0x12c   : > { %1313 = vmatpush1.bf16.msra.mxu1 %v3302_v35 }
 0x12d   : > { %1314 = vmatprep.subr.bf16.mxu1 %v3310_v40  ;;  %1110 = vmatpush2.bf16.msra.mxu0 %v3317_v46 }
 0x12e   : > { %1111 = vmatprep.subr.bf16.mxu0 %v3318_v47 }
 0x130   : > { %1315 = vmatpush2.bf16.msra.mxu1 %v3308_v39 }
 0x131   : > { %1316 = vmatprep.subr.bf16.mxu1 %v3316_v45  ;;  %1112 = vmatpush2.bf16.msra.mxu0 %v3323_v50 }
 0x132   : > { %1113 = vmatprep.subr.bf16.mxu0 %v3324_v51 }
 0x134   : > { %1317 = vmatpush2.bf16.msra.mxu1 %v3314_v44 }
 0x135   : > { %1318 = vmatprep.subr.bf16.mxu1 %v3322_v48  ;;  %1114 = vmatpush2.bf16.msra.mxu0 %v3329_v54 }
 0x136   : > { %1115 = vmatprep.subr.bf16.mxu0 %v3330_v55 }
 0x138   : > { %1319 = vmatpush2.bf16.msra.mxu1 %v3320_v49 }
 0x139   : > { %1320 = vmatprep.subr.bf16.mxu1 %v3328_v52  ;;  %1116 = vmatpush2.bf16.msra.mxu0 %v3335_v58 }
 0x13a   : > { %1572 = vmatprep.subr.bf16.mxu0 %v3341_v60 }
 0x13c   : > { %1321 = vmatpush2.bf16.msra.mxu1 %v3326_v53 }
 0x13d   : > { %1322 = vmatprep.subr.bf16.mxu1 %v3334_v56 }
 0x140   : > { %1323 = vmatpush2.bf16.msra.mxu1 %v3332_v57 }
 0x141   : > { %1324 = vmatprep.subr.bf16.mxu1 %v3338_v59 }
 0x144   : > { %1325 = vmatpush2.bf16.msra.mxu1 %v3336_v61  ;;  %v3339_v61 = vld [vmem:[#allocation2 + $0x270] ss:$8 sps:$4 sm:$0xff]  }
 0x145   : > { %1326 = vmatprep.subr.bf16.mxu1 %v3344_v62 }
 0x148   : > { %1327 = vmatpush2.bf16.msra.mxu1 %v3342_v63 }
 0x149   : > { %1328 = vmatprep.subr.bf16.mxu1 %v3350_v1  ;;  %v3347_v1 = vld [vmem:[#allocation2 + $0x264] ss:$8 sps:$4 sm:$0xff]  }
 0x14c   : > { %1329 = vmatpush2.bf16.msra.mxu1 %v3348_v0 }
 0x1af   : > { %v532_v2 = vpop.f32.mrf.mxu1 }
 0x1b1   : > { %v534_v3 = vpop.f32.mrf.mxu1 }
 0x1b3   : > { %v536_v4 = vpop.f32.mrf.mxu1 }
 0x1b5   : > { %v538_v5 = vpop.f32.mrf.mxu1 }
 0x1b7   : > { %v542_v6 = vpop.f32.mrf.mxu1 }
 0x1b9   : > { %v544_v8 = vpop.f32.mrf.mxu1 }
 0x1bb   : > { %v546_v9 = vpop.f32.mrf.mxu1 }
 0x1bd   : > { %v548_v10 = vpop.f32.mrf.mxu1 }
 0x1bf   : > { %v631_v11 = vpop.f32.mrf.mxu1 }
 0x1c0   : > { %v632_v27 = vadd.f32 %v631_v11, %v532_v2 }
 0x1c1   : > { %v633_v13 = vpop.f32.mrf.mxu1 }
 0x1c2   : > { %v634_v25 = vadd.f32 %v633_v13, %v534_v3 }
 0x1c3   : > { %v635_v14 = vpop.f32.mrf.mxu1 }
 0x1c4   : > { %v636_v28 = vadd.f32 %v635_v14, %v536_v4  ;;  %v3353_v14 = vld [vmem:[#allocation2 + $0x254] ss:$8 sps:$4 sm:$0xff]  }
 0x1c5   : > { %v637_v15 = vpop.f32.mrf.mxu1 }
 0x1c6   : > { %v638_v36 = vadd.f32 %v637_v15, %v538_v5 }
 0x1c7   : > { %v641_v16 = vpop.f32.mrf.mxu1 }
 0x1c8   : > { %v642_v47 = vadd.f32 %v641_v16, %v542_v6 }
 0x1c9   : > { %v643_v12 = vpop.f32.mrf.mxu1 }
 0x1ca   : > { %v644_v43 = vadd.f32 %v643_v12, %v544_v8 }
 0x1cb   : > { %v645_v17 = vpop.f32.mrf.mxu1 }
 0x1cc   : > { %v646_v50 = vadd.f32 %v645_v17, %v546_v9 }
 0x1cd   : > { %v647_v20 = vpop.f32.mrf.mxu1 }
 0x1ce   : > { %v648_v54 = vadd.f32 %v647_v20, %v548_v10  ;;  %v3345_v10 = vld [vmem:[#allocation2 + $0x260] ss:$8 sps:$4 sm:$0xff]  }
 0x1cf   : > { %v766_v22 = vpop.f32.mrf.mxu1 }
 0x1d0   : > { %v785_v33 = vadd.f32 %v766_v22, %v632_v27 }
 0x1d1   : > { %v768_v26 = vpop.f32.mrf.mxu1 }
 0x1d2   : > { %v786_v29 = vadd.f32 %v768_v26, %v634_v25  ;;  %v812_v44 = vadd.f32 %v807_v34, %v785_v33 }
 0x1d3   : > { %v770_v32 = vpop.f32.mrf.mxu1 }
 0x1d4   : > { %v787_v35 = vadd.f32 %v770_v32, %v636_v28  ;;  %v813_v39 = vadd.f32 %v811_v30, %v786_v29  ;;  %v3853_v55 = vmax.f32 %v812_v44, 0.0  ;;  %v3356_v29 = vld [vmem:[#allocation2 + $0x244] ss:$8 sps:$4 sm:$0xff]  }
 0x1d5   : > { %v772_v37 = vpop.f32.mrf.mxu1 }
 0x1d6   : > { %v814_v38 = vadd.f32 %v807_v34, %v787_v35  ;;  %v788_v40 = vadd.f32 %v772_v37, %v638_v36  ;;  %v3851_v51 = vmax.f32 %v813_v39, 0.0  ;;  %v828_v11 = vrot.slane %v3853_v55, 7  ;;  %v3354_v37 = vld [vmem:[#allocation2 + $0x240] ss:$8 sps:$4 sm:$0xff]  }
 0x1d7   : > { %v776_v42 = vpop.f32.mrf.mxu1 }
 0x1d8   : > { %v815_v45 = vadd.f32 %v811_v30, %v788_v40  ;;  %v3849_v48 = vmax.f32 %v814_v38, 0.0  ;;  %v789_v56 = vadd.f32 %v776_v42, %v642_v47  ;;  %v829_v15 = vrot.slane %v3851_v51, 7  ;;  %v3359_v40 = vld [vmem:[#allocation2 + $0x234] ss:$8 sps:$4 sm:$0xff]  }
 0x1d9   : > { %v778_v46 = vpop.f32.mrf.mxu1  ;;  %v1352_v16 = vrot.slane %v3851_v51, 1 }
 0x1da   : > { %v790_v49 = vadd.f32 %v778_v46, %v644_v43  ;;  %v823_v52 = vmax.f32 %v815_v45, 0.0  ;;  %v3862_v0 = vpack.c.bf16 %v3849_v48, %v3853_v55  ;;  %v816_v3 = vadd.f32 %v807_v34, %v789_v56  ;;  %v3357_v43 = vld [vmem:[#allocation2 + $0x230] ss:$8 sps:$4 sm:$0xff]   ;;  %v3362_v45 = vld [vmem:[#allocation2 + $0x224] ss:$8 sps:$4 sm:$0xff]  }
 0x1db   : > { %v780_v53 = vpop.f32.mrf.mxu1  ;;  %v830_v12 = vrot.slane %v3849_v48, 7  ;;  %v3371_v56 = vld [vmem:[#allocation2 + $0x2f4] ss:$8 sps:$4 sm:$0xff]  }
 0x1dc   : > { %v817_v57 = vadd.f32 %v811_v30, %v790_v49  ;;  %v791_v58 = vadd.f32 %v780_v53, %v646_v50  ;;  %v3856_v60 = vpack.c.bf16 %v823_v52, %v3851_v51  ;;  %v831_v6 = vrot.slane %v823_v52, 7  ;;  %v3360_v49 = vld [vmem:[#allocation2 + $0x220] ss:$8 sps:$4 sm:$0xff]   ;;  %v3365_v50 = vld [vmem:[#allocation2 + $0x214] ss:$8 sps:$4 sm:$0xff]  }
 0x1dd   : > { %v782_v59 = vpop.f32.mrf.mxu1  ;;  %v1354_v8 = vrot.slane %v823_v52, 1  ;;  %v3876_v18 = vmax.f32 %v816_v3, 0.0  ;;  %v840_v35 = vsel %vm409_vm2, %v828_v11, %v830_v12  ;;  %v3363_v52 = vld [vmem:[#allocation2 + $0x210] ss:$8 sps:$4 sm:$0xff]   ;;  %v3368_v53 = vld [vmem:[#allocation2 + $0x204] ss:$8 sps:$4 sm:$0xff]  }
 0x1de   : > { %v3858_v62 = vmax.f32 %v817_v57, 0.0  ;;  %v792_v63 = vadd.f32 %v782_v59, %v648_v54  ;;  %v818_v2 = vadd.f32 %v807_v34, %v791_v58  ;;  %1117 = vmatprep.mubr.bf16.mxu0 %v3856_v60  ;;  %v841_v26 = vsel %vm409_vm2, %v829_v15, %v831_v6  ;;  %v3366_v54 = vld [vmem:[#allocation2 + $0x200] ss:$8 sps:$4 sm:$0xff]   ;;  %v3369_v57 = vld [vmem:[#allocation2 + $0x2f0] ss:$8 sps:$4 sm:$0xff]  }
 0x1df   : > { %1118 = vmatmul.mubr.bf16.vlgmr.msra.gmra.mxu0 %v3862_v0  ;;  %v1364_v25 = vsel %vm654_vm4, %v1352_v16, %v1354_v8  ;;  %v832_v42 = vrot.slane %v3876_v18, 7  ;;  %v3374_v58 = vld [vmem:[#allocation2 + $0x2e4] ss:$8 sps:$4 sm:$0xff]   ;;  %v3372_v59 = vld [vmem:[#allocation2 + $0x2e0] ss:$8 sps:$4 sm:$0xff]  }
 0x1e0   : > { %v1356_v4 = vrot.slane %v3858_v62, 1  ;;  %v819_v5 = vadd.f32 %v811_v30, %v792_v63  ;;  %v3867_v9 = vmax.f32 %v818_v2, 0.0  ;;  %1573 = vmatpush1.bf16.msra.mxu0 %v3339_v61  ;;  %v833_v23 = vrot.slane %v3858_v62, 7  ;;  %v3377_v61 = vld [vmem:[#allocation2 + $0x2d4] ss:$8 sps:$4 sm:$0xff]  }
 0x1e1   : > { %1574 = vmatprep.subr.bf16.mxu0 %v3347_v1  ;;  %v838_v46 = vsel %vm409_vm2, %v830_v12, %v832_v42  ;;  %v3375_v63 = vld [vmem:[#allocation2 + $0x2d0] ss:$8 sps:$4 sm:$0xff]   ;;  %v3380_v1 = vld [vmem:[#allocation2 + $0x2c4] ss:$8 sps:$4 sm:$0xff]   ;;  %v3378_v2 = vld [vmem:[#allocation2 + $0x2c0] ss:$8 sps:$4 sm:$0xff]  }
 0x1e2   : > { %v3870_v13 = vmax.f32 %v819_v5, 0.0  ;;  %v834_v17 = vrot.slane %v3867_v9, 7  ;;  %v1362_v22 = vsel %vm654_vm4, %v1354_v8, %v1356_v4  ;;  %v3901_v41 = vpack.c.bf16 %v3867_v9, %v3876_v18  ;;  %v3383_v3 = vld [vmem:[#allocation2 + $0x2b4] ss:$8 sps:$4 sm:$0xff]   ;;  %v3381_v5 = vld [vmem:[#allocation2 + $0x2b0] ss:$8 sps:$4 sm:$0xff]  }
 0x1e3   : > { %v1376_v30 = vpack.c.bf16 %v1362_v22, %v1364_v25  ;;  %v839_v38 = vsel %vm409_vm2, %v831_v6, %v833_v23  ;;  %v3386_v6 = vld [vmem:[#allocation2 + $0x2a4] ss:$8 sps:$4 sm:$0xff]   ;;  %v3384_v8 = vld [vmem:[#allocation2 + $0x2a0] ss:$8 sps:$4 sm:$0xff]   ;;  %v1351_v22 = vrot.slane %v3853_v55, 1  ;;  %v1357_v7 = vrot.slane %v3867_v9, 1 }
 0x1e4   : > { %v835_v19 = vrot.slane %v3870_v13, 7  ;;  %v3881_v20 = vpack.c.bf16 %v3870_v13, %v3858_v62  ;;  %1575 = vmatpush1.bf16.msra.mxu0 %v3345_v10  ;;  %v842_v27 = vsel %vm409_vm2, %v834_v17, %v828_v11  ;;  %v836_v44 = vsel %vm409_vm2, %v832_v42, %v834_v17  ;;  %v3389_v10 = vld [vmem:[#allocation2 + $0x294] ss:$8 sps:$4 sm:$0xff]   ;;  %v3387_v11 = vld [vmem:[#allocation2 + $0x290] ss:$8 sps:$4 sm:$0xff]  }
 0x1e5   : > { %1576 = vmatprep.subr.bf16.mxu0 %v3353_v14  ;;  %v2989_v36 = vpack.c.bf16 %v840_v35, %v842_v27  ;;  %v854_v47 = vpack.c.bf16 %v836_v44, %v838_v46  ;;  %v3392_v14 = vld [vmem:[#allocation2 + $0x284] ss:$8 sps:$4 sm:$0xff]   ;;  %v1358_v12 = vrot.slane %v3870_v13, 1  ;;  %v1353_v17 = vrot.slane %v3849_v48, 1  ;;  %v3393_v25 = vld [vmem:[#allocation2 + $0x470] ss:$8 sps:$4 sm:$0xff]  }
 0x1e6   : > { %1127 = vmatprep.mubr.bf16.mxu0 %v3881_v20  ;;  %v843_v28 = vsel %vm409_vm2, %v835_v19, %v829_v15  ;;  %v837_v34 = vsel %vm409_vm2, %v833_v23, %v835_v19  ;;  %v1355_v15 = vrot.slane %v3876_v18, 1  ;;  %v3390_v19 = vld [vmem:[#allocation2 + $0x280] ss:$8 sps:$4 sm:$0xff]   ;;  %v3398_v27 = vld [vmem:[#allocation2 + $0x464] ss:$8 sps:$4 sm:$0xff]  }
 0x1e7   : > { %v2985_v33 = vpack.c.bf16 %v841_v26, %v843_v28  ;;  %1128 = vmatmul.mubr.bf16.gmra.mxu0 %v3901_v41  ;;  %v855_v39 = vpack.c.bf16 %v837_v34, %v839_v38  ;;  %v1360_v18 = vsel %vm654_vm4, %v1356_v4, %v1358_v12  ;;  %v1366_v48 = vsel %vm654_vm4, %v1358_v12, %v1352_v16  ;;  %v3395_v26 = vld [vmem:[#allocation2 + $0x474] ss:$8 sps:$4 sm:$0xff]   ;;  %v3396_v9 = vld [vmem:[#allocation2 + $0x460] ss:$8 sps:$4 sm:$0xff]   ;;  %v3399_v28 = vld [vmem:[#allocation2 + $0x450] ss:$8 sps:$4 sm:$0xff]  }
 0x1e8   : > { %1577 = vmatpush1.bf16.msra.mxu0 %v3351_v24  ;;  %1604 = vmatprep.mubr.bf16.mxu0 %v1376_v30  ;;  %v1361_v23 = vsel %vm654_vm4, %v1353_v17, %v1355_v15  ;;  %v1363_v13 = vsel %vm654_vm4, %v1351_v22, %v1353_v17  ;;  %v3025_v62 = vpack.c.bf16 %v1366_v48, %v1360_v18  ;;  %v3404_v30 = vld [vmem:[#allocation2 + $0x374] ss:$8 sps:$4 sm:$0xff]   ;;  %v3405_v34 = vld [vmem:[#allocation2 + $0x440] ss:$8 sps:$4 sm:$0xff]   ;;  %v3407_v35 = vld [vmem:[#allocation2 + $0x444] ss:$8 sps:$4 sm:$0xff]  }
 0x1e9   : > { %2986 = vmatprep.mubr.msk.bf16.mxu1 %vm3906_vm8, %v2985_v33  ;;  %1578 = vmatprep.subr.bf16.mxu0 %v3356_v29  ;;  %v1375_v55 = vpack.c.bf16 %v1361_v23, %v1363_v13  ;;  %v1359_v51 = vsel %vm654_vm4, %v1355_v15, %v1357_v7  ;;  %v1365_v4 = vsel %vm654_vm4, %v1357_v7, %v1351_v22  ;;  %v3401_v29 = vld [vmem:[#allocation2 + $0x454] ss:$8 sps:$4 sm:$0xff]   ;;  %v3402_v33 = vld [vmem:[#allocation2 + $0x370] ss:$8 sps:$4 sm:$0xff]   ;;  %v3419_v42 = vld [vmem:[#allocation2 + $0x424] ss:$8 sps:$4 sm:$0xff]  }
 0x1ea   : > { %2990 = vmatmul.mubr.msk.bf16.vlgmr.msra.gmra.mxu1 %vm3906_vm8, %v2989_v36  ;;  %v3029_v16 = vpack.c.bf16 %v1365_v4, %v1359_v51  ;;  %1925 = vmatprep.subr.bf16.mxu1 %v3395_v26  ;;  %v3410_v36 = vld [vmem:[#allocation2 + $0x364] ss:$8 sps:$4 sm:$0xff]   ;;  %v3413_v38 = vld [vmem:[#allocation2 + $0x434] ss:$8 sps:$4 sm:$0xff]   ;;  %v3417_v44 = vld [vmem:[#allocation2 + $0x420] ss:$8 sps:$4 sm:$0xff]  }
 0x1eb   : > { %1340 = vmatprep.mubr.bf16.mxu1 %v855_v39  ;;  %1926 = vmatpush1.bf16.msra.mxu1 %v3393_v25  ;;  %v3411_v39 = vld [vmem:[#allocation2 + $0x430] ss:$8 sps:$4 sm:$0xff]   ;;  %v3425_v46 = vld [vmem:[#allocation2 + $0x414] ss:$8 sps:$4 sm:$0xff]   ;;  %v3453_v15 = vld [vmem:[#allocation2 + $0x4c0] ss:$8 sps:$4 sm:$0xff]  }
 0x1ec   : > { %1579 = vmatpush1.bf16.msra.mxu0 %v3354_v37  ;;  %1927 = vmatprep.subr.bf16.mxu1 %v3398_v27  ;;  %v3408_v37 = vld [vmem:[#allocation2 + $0x360] ss:$8 sps:$4 sm:$0xff]   ;;  %v3458_v12 = vld [vmem:[#allocation2 + $0x3e4] ss:$8 sps:$4 sm:$0xff]   ;;  %v3461_v17 = vld [vmem:[#allocation2 + $0x4b4] ss:$8 sps:$4 sm:$0xff]  }
 0x1ed   : > { %1580 = vmatprep.subr.bf16.mxu0 %v3359_v40  ;;  %v3416_v40 = vld [vmem:[#allocation2 + $0x354] ss:$8 sps:$4 sm:$0xff]   ;;  %v3459_v22 = vld [vmem:[#allocation2 + $0x4b0] ss:$8 sps:$4 sm:$0xff]   ;;  %v3467_v48 = vld [vmem:[#allocation2 + $0x4a4] ss:$8 sps:$4 sm:$0xff]  }
 0x1ee   : > { %v3464_v23 = vld [vmem:[#allocation2 + $0x3d4] ss:$8 sps:$4 sm:$0xff]   ;;  %v3462_v18 = vld [vmem:[#allocation2 + $0x3d0] ss:$8 sps:$4 sm:$0xff]   ;;  %v3465_v13 = vld [vmem:[#allocation2 + $0x4a0] ss:$8 sps:$4 sm:$0xff]  }
 0x1ef   : > { %1928 = vmatpush1.bf16.msra.mxu1 %v3396_v9  ;;  %v3468_v7 = vld [vmem:[#allocation2 + $0x3c0] ss:$8 sps:$4 sm:$0xff]   ;;  %v3471_v51 = vld [vmem:[#allocation2 + $0x490] ss:$8 sps:$4 sm:$0xff]   ;;  %v3476_v4 = vld [vmem:[#allocation2 + $0x3b4] ss:$8 sps:$4 sm:$0xff]  }
 0x1f0   : > { %1581 = vmatpush1.bf16.msra.mxu0 %v3357_v43  ;;  %1929 = vmatprep.subr.bf16.mxu1 %v3401_v29  ;;  %v3414_v43 = vld [vmem:[#allocation2 + $0x350] ss:$8 sps:$4 sm:$0xff]   ;;  %v3479_v25 = vld [vmem:[#allocation2 + $0x484] ss:$8 sps:$4 sm:$0xff]   ;;  %v3477_v26 = vld [vmem:[#allocation2 + $0x480] ss:$8 sps:$4 sm:$0xff]  }
 0x1f1   : > { %1582 = vmatprep.subr.bf16.mxu0 %v3362_v45  ;;  %v3422_v45 = vld [vmem:[#allocation2 + $0x344] ss:$8 sps:$4 sm:$0xff]   ;;  %v3480_v27 = vld [vmem:[#allocation2 + $0x3a0] ss:$8 sps:$4 sm:$0xff]   ;;  %v3488_v29 = vld [vmem:[#allocation2 + $0x394] ss:$8 sps:$4 sm:$0xff]  }
 0x1f2   : > { %1341 = vmatmul.mubr.bf16.gmra.mxu1 %v854_v47  ;;  %v3420_v47 = vld [vmem:[#allocation2 + $0x340] ss:$8 sps:$4 sm:$0xff]   ;;  %v3482_v9 = vld [vmem:[#allocation2 + $0x3a4] ss:$8 sps:$4 sm:$0xff]  }
 0x1f3   : > { %1930 = vmatpush1.bf16.msra.mxu1 %v3399_v28  ;;  %v3485_v28 = vld [vmem:[#allocation2 + $0x574] ss:$8 sps:$4 sm:$0xff]  }
 0x1f4   : > { %1583 = vmatpush1.bf16.msra.mxu0 %v3360_v49  ;;  %1931 = vmatprep.subr.bf16.mxu1 %v3407_v35  ;;  %v3423_v49 = vld [vmem:[#allocation2 + $0x410] ss:$8 sps:$4 sm:$0xff]   ;;  %v3500_v35 = vld [vmem:[%s4173_s4 + $0x74] ss:$8 sps:$4 sm:$0xff]  }
 0x1f5   : > { %1584 = vmatprep.subr.bf16.mxu0 %v3365_v50  ;;  %v3428_v50 = vld [vmem:[#allocation2 + $0x334] ss:$8 sps:$4 sm:$0xff]  }
 0x1f7   : > { %1932 = vmatpush1.bf16.msra.mxu1 %v3405_v34  ;;  %v3494_v34 = vld [vmem:[#allocation2 + $0x384] ss:$8 sps:$4 sm:$0xff]  }
 0x1f8   : > { %1585 = vmatpush1.bf16.msra.mxu0 %v3363_v52  ;;  %1933 = vmatprep.subr.bf16.mxu1 %v3413_v38  ;;  %v3431_v52 = vld [vmem:[#allocation2 + $0x404] ss:$8 sps:$4 sm:$0xff]  }
 0x1f9   : > { %1586 = vmatprep.subr.bf16.mxu0 %v3368_v53  ;;  %v3426_v53 = vld [vmem:[#allocation2 + $0x330] ss:$8 sps:$4 sm:$0xff]  }
 0x1fb   : > { %1934 = vmatpush1.bf16.msra.mxu1 %v3411_v39 }
 0x1fc   : > { %1587 = vmatpush1.bf16.msra.mxu0 %v3366_v54  ;;  %1935 = vmatprep.subr.bf16.mxu1 %v3419_v42  ;;  %v3429_v54 = vld [vmem:[#allocation2 + $0x400] ss:$8 sps:$4 sm:$0xff]  }
 0x1fd   : > { %1588 = vmatprep.subr.bf16.mxu0 %v3371_v56  ;;  %v3434_v56 = vld [vmem:[#allocation2 + $0x324] ss:$8 sps:$4 sm:$0xff]  }
 0x1ff   : > { %1936 = vmatpush1.bf16.msra.mxu1 %v3417_v44 }
 0x200   : > { %1589 = vmatpush2.bf16.msra.mxu0 %v3369_v57  ;;  %1937 = vmatprep.subr.bf16.mxu1 %v3425_v46  ;;  %v3437_v57 = vld [vmem:[#allocation2 + $0x4f4] ss:$8 sps:$4 sm:$0xff]  }
 0x201   : > { %1590 = vmatprep.subr.bf16.mxu0 %v3374_v58  ;;  %v3432_v58 = vld [vmem:[#allocation2 + $0x320] ss:$8 sps:$4 sm:$0xff]  }
 0x203   : > { %1938 = vmatpush1.bf16.msra.mxu1 %v3423_v49  ;;  %v1639_v49 = vsub.s32 5, %v3751_v31 }
 0x204   : > { %1591 = vmatpush2.bf16.msra.mxu0 %v3372_v59  ;;  %1939 = vmatprep.subr.bf16.mxu1 %v3431_v52  ;;  %v3435_v59 = vld [vmem:[#allocation2 + $0x4f0] ss:$8 sps:$4 sm:$0xff]  }
 0x205   : > { %1592 = vmatprep.subr.bf16.mxu0 %v3377_v61  ;;  %v3440_v61 = vld [vmem:[#allocation2 + $0x314] ss:$8 sps:$4 sm:$0xff]  }
 0x207   : > { %1940 = vmatpush1.bf16.msra.mxu1 %v3429_v54 }
 0x208   : > { %1593 = vmatpush2.bf16.msra.mxu0 %v3375_v63  ;;  %1941 = vmatprep.subr.bf16.mxu1 %v3437_v57  ;;  %v3443_v63 = vld [vmem:[#allocation2 + $0x4e4] ss:$8 sps:$4 sm:$0xff]  }
 0x209   : > { %1594 = vmatprep.subr.bf16.mxu0 %v3380_v1  ;;  %v3438_v1 = vld [vmem:[#allocation2 + $0x310] ss:$8 sps:$4 sm:$0xff]  }
 0x20b   : > { %1942 = vmatpush2.bf16.msra.mxu1 %v3435_v59 }
 0x20c   : > { %1595 = vmatpush2.bf16.msra.mxu0 %v3378_v2  ;;  %v3441_v2 = vld [vmem:[#allocation2 + $0x4e0] ss:$8 sps:$4 sm:$0xff]   ;;  %1943 = vmatprep.subr.bf16.mxu1 %v3443_v63 }
 0x20d   : > { %1596 = vmatprep.subr.bf16.mxu0 %v3383_v3  ;;  %v3446_v3 = vld [vmem:[#allocation2 + $0x304] ss:$8 sps:$4 sm:$0xff]  }
 0x20f   : > { %1944 = vmatpush2.bf16.msra.mxu1 %v3441_v2 }
 0x210   : > { %1597 = vmatpush2.bf16.msra.mxu0 %v3381_v5  ;;  %v3449_v5 = vld [vmem:[#allocation2 + $0x4d4] ss:$8 sps:$4 sm:$0xff]  }
 0x211   : > { %1598 = vmatprep.subr.bf16.mxu0 %v3386_v6  ;;  %v3444_v6 = vld [vmem:[#allocation2 + $0x300] ss:$8 sps:$4 sm:$0xff]   ;;  %1945 = vmatprep.subr.bf16.mxu1 %v3449_v5 }
 0x214   : > { %1599 = vmatpush2.bf16.msra.mxu0 %v3384_v8  ;;  %v3447_v8 = vld [vmem:[#allocation2 + $0x4d0] ss:$8 sps:$4 sm:$0xff]  }
 0x215   : > { %1600 = vmatprep.subr.bf16.mxu0 %v3389_v10  ;;  %v3452_v10 = vld [vmem:[#allocation2 + $0x3f4] ss:$8 sps:$4 sm:$0xff]   ;;  %1946 = vmatpush2.bf16.msra.mxu1 %v3447_v8 }
 0x218   : > { %1601 = vmatpush2.bf16.msra.mxu0 %v3387_v11  ;;  %v3455_v11 = vld [vmem:[#allocation2 + $0x4c4] ss:$8 sps:$4 sm:$0xff]  }
 0x219   : > { %1602 = vmatprep.subr.bf16.mxu0 %v3392_v14  ;;  %v3450_v14 = vld [vmem:[#allocation2 + $0x3f0] ss:$8 sps:$4 sm:$0xff]   ;;  %1947 = vmatprep.subr.bf16.mxu1 %v3455_v11 }
 0x21a   : > { %1948 = vmatpush2.bf16.msra.mxu1 %v3453_v15 }
 0x21b   : > { %1949 = vmatprep.subr.bf16.mxu1 %v3461_v17 }
 0x21c   : > { %1603 = vmatpush2.bf16.msra.mxu0 %v3390_v19  ;;  %v3456_v19 = vld [vmem:[#allocation2 + $0x3e0] ss:$8 sps:$4 sm:$0xff]  }
 0x21d   : > { %2138 = vmatprep.subr.bf16.mxu0 %v3404_v30  ;;  %v3486_v30 = vld [vmem:[#allocation2 + $0x390] ss:$8 sps:$4 sm:$0xff]  }
 0x21e   : > { %1950 = vmatpush2.bf16.msra.mxu1 %v3459_v22 }
 0x21f   : > { %1605 = vmatmul.mubr.bf16.vlgmr.msra.gmra.mxu0 %v1375_v55  ;;  %1951 = vmatprep.subr.bf16.mxu1 %v3467_v48  ;;  %v3470_v55 = vld [vmem:[#allocation2 + $0x3c4] ss:$8 sps:$4 sm:$0xff]  }
 0x220   : > { %3026 = vmatprep.mubr.msk.bf16.mxu0 %vm3945_vm10, %v3025_v62  ;;  %2139 = vmatpush1.bf16.msra.mxu0 %v3402_v33  ;;  %v3473_v62 = vld [vmem:[#allocation2 + $0x494] ss:$8 sps:$4 sm:$0xff]   ;;  %v3492_v33 = vld [vmem:[#allocation2 + $0x380] ss:$8 sps:$4 sm:$0xff]  }
 0x221   : > { %2140 = vmatprep.subr.bf16.mxu0 %v3410_v36 }
 0x222   : > { %1952 = vmatpush2.bf16.msra.mxu1 %v3465_v13 }
 0x223   : > { %1953 = vmatprep.subr.bf16.mxu1 %v3473_v62 }
 0x224   : > { %2141 = vmatpush1.bf16.msra.mxu0 %v3408_v37 }
 0x225   : > { %2142 = vmatprep.subr.bf16.mxu0 %v3416_v40 }
 0x226   : > { %1954 = vmatpush2.bf16.msra.mxu1 %v3471_v51 }
 0x227   : > { %3030 = vmatmul.mubr.msk.bf16.gmra.mxu0 %vm3945_vm10, %v3029_v16  ;;  %v3474_v16 = vld [vmem:[#allocation2 + $0x3b0] ss:$8 sps:$4 sm:$0xff]   ;;  %1955 = vmatprep.subr.bf16.mxu1 %v3479_v25 }
 0x228   : > { %2143 = vmatpush1.bf16.msra.mxu0 %v3414_v43 }
 0x229   : > { %2144 = vmatprep.subr.bf16.mxu0 %v3422_v45 }
 0x22a   : > { %1956 = vmatpush2.bf16.msra.mxu1 %v3477_v26 }
 0x22b   : > { %2412 = vmatprep.subr.bf16.mxu1 %v3485_v28 }
 0x22c   : > { %2145 = vmatpush1.bf16.msra.mxu0 %v3420_v47 }
 0x22d   : > { %2146 = vmatprep.subr.bf16.mxu0 %v3428_v50  ;;  %v1635_v50 = vsub.s32 1, %v3751_v31 }
 0x22f   : > { %v1636_v57 = vrot.slane %v3845_v21, %v1635_v50 }
 0x230   : > { %2147 = vmatpush1.bf16.msra.mxu0 %v3426_v53 }
 0x231   : > { %2148 = vmatprep.subr.bf16.mxu0 %v3434_v56  ;;  %v1640_v56 = vrot.slane %v3845_v21, %v1639_v49  ;;  %v1646_v8 = vrot.slane %v1636_v57, %v1635_v50 }
 0x234   : > { %2149 = vmatpush1.bf16.msra.mxu0 %v3432_v58 }
 0x235   : > { %2150 = vmatprep.subr.bf16.mxu0 %v3440_v61 }
 0x238   : > { %2151 = vmatpush1.bf16.msra.mxu0 %v3438_v1 }
 0x239   : > { %2152 = vmatprep.subr.bf16.mxu0 %v3446_v3  ;;  %v1650_v3 = vrot.slane %v1640_v56, %v1635_v50 }
 0x23c   : > { %2153 = vmatpush1.bf16.msra.mxu0 %v3444_v6 }
 0x23d   : > { %2154 = vmatprep.subr.bf16.mxu0 %v3452_v10 }
 0x240   : > { %2155 = vmatpush2.bf16.msra.mxu0 %v3450_v14 }
 0x241   : > { %2156 = vmatprep.subr.bf16.mxu0 %v3458_v12 }
 0x244   : > { %2157 = vmatpush2.bf16.msra.mxu0 %v3456_v19 }
 0x245   : > { %2158 = vmatprep.subr.bf16.mxu0 %v3464_v23 }
 0x248   : > { %2159 = vmatpush2.bf16.msra.mxu0 %v3462_v18 }
 0x249   : > { %2160 = vmatprep.subr.bf16.mxu0 %v3470_v55 }
 0x24c   : > { %2161 = vmatpush2.bf16.msra.mxu0 %v3468_v7 }
 0x24d   : > { %2162 = vmatprep.subr.bf16.mxu0 %v3476_v4 }
 0x250   : > { %2163 = vmatpush2.bf16.msra.mxu0 %v3474_v16 }
 0x251   : > { %2164 = vmatprep.subr.bf16.mxu0 %v3482_v9 }
 0x254   : > { %2165 = vmatpush2.bf16.msra.mxu0 %v3480_v27 }
 0x255   : > { %2166 = vmatprep.subr.bf16.mxu0 %v3488_v29 }
 0x258   : > { %2167 = vmatpush2.bf16.msra.mxu0 %v3486_v30 }
 0x259   : > { %2168 = vmatprep.subr.bf16.mxu0 %v3494_v34  ;;  %v3483_v34 = vld [vmem:[#allocation2 + $0x570] ss:$8 sps:$4 sm:$0xff]  }
 0x25c   : > { %2169 = vmatpush2.bf16.msra.mxu0 %v3492_v33 }
 0x25d   : > { %2709 = vmatprep.subr.bf16.mxu0 %v3500_v35 }
 0x29f   : > { %v1119_v36 = vpop.f32.mrf.mxu0 }
 0x2a1   : > { %v1121_v37 = vpop.f32.mrf.mxu0 }
 0x2a3   : > { %v1123_v38 = vpop.f32.mrf.mxu0 }
 0x2a5   : > { %v1125_v39 = vpop.f32.mrf.mxu0 }
 0x2a7   : > { %v1129_v42 = vpop.f32.mrf.mxu0 }
 0x2a9   : > { %v1131_v44 = vpop.f32.mrf.mxu0 }
 0x2aa   : > { %v1332_v40 = vpop.f32.mrf.mxu1 }
 0x2ab   : > { %v1133_v46 = vpop.f32.mrf.mxu0  ;;  %v1333_v63 = vadd.f32 %v1332_v40, %v1119_v36 }
 0x2ac   : > { %v1334_v43 = vpop.f32.mrf.mxu1 }
 0x2ad   : > { %v1135_v52 = vpop.f32.mrf.mxu0  ;;  %v1335_v58 = vadd.f32 %v1334_v43, %v1121_v37 }
 0x2ae   : > { %v1336_v45 = vpop.f32.mrf.mxu1 }
 0x2af   : > { %v1337_v1 = vadd.f32 %v1336_v45, %v1123_v38  ;;  %v3491_v38 = vld [vmem:[#allocation2 + $0x564] ss:$8 sps:$4 sm:$0xff]  }
 0x2b0   : > { %v1338_v47 = vpop.f32.mrf.mxu1 }
 0x2b1   : > { %v1339_v11 = vadd.f32 %v1338_v47, %v1125_v39  ;;  %v3489_v47 = vld [vmem:[#allocation2 + $0x560] ss:$8 sps:$4 sm:$0xff]  }
 0x2b2   : > { %v1342_v53 = vpop.f32.mrf.mxu1 }
 0x2b3   : > { %v1343_v55 = vadd.f32 %v1342_v53, %v1129_v42 }
 0x2b4   : > { %v1344_v59 = vpop.f32.mrf.mxu1 }
 0x2b5   : > { %v1345_v21 = vadd.f32 %v1344_v59, %v1131_v44 }
 0x2b6   : > { %v1346_v14 = vpop.f32.mrf.mxu1 }
 0x2b7   : > { %v1347_v7 = vadd.f32 %v1346_v14, %v1133_v46 }
 0x2b8   : > { %v1348_v18 = vpop.f32.mrf.mxu1 }
 0x2b9   : > { %v1349_v26 = vadd.f32 %v1348_v18, %v1135_v52  ;;  %v3497_v52 = vld [vmem:[#allocation2 + $0x554] ss:$8 sps:$4 sm:$0xff]   ;;  %v3506_v18 = vld [vmem:[%s4173_s4 + $0x64] ss:$8 sps:$4 sm:$0xff]  }
 0x2df   : > { %v1606_v54 = vpop.f32.mrf.mxu0 }
 0x2e0   : > { %v1625_v6 = vadd.f32 %v1606_v54, %v1333_v63 }
 0x2e1   : > { %v1608_v61 = vpop.f32.mrf.mxu0 }
 0x2e2   : > { %v1626_v2 = vadd.f32 %v1608_v61, %v1335_v58  ;;  %v1651_v23 = vadd.f32 %v1646_v8, %v1625_v6 }
 0x2e3   : > { %v1610_v5 = vpop.f32.mrf.mxu0 }
 0x2e4   : > { %v1627_v10 = vadd.f32 %v1610_v5, %v1337_v1  ;;  %v1652_v17 = vadd.f32 %v1650_v3, %v1626_v2  ;;  %v3969_v9 = vmax.f32 %v1651_v23, 0.0  ;;  %v3495_v2 = vld [vmem:[#allocation2 + $0x550] ss:$8 sps:$4 sm:$0xff]   ;;  %v3501_v23 = vld [vmem:[#allocation2 + $0x540] ss:$8 sps:$4 sm:$0xff]  }
 0x2e5   : > { %v1612_v15 = vpop.f32.mrf.mxu0 }
 0x2e6   : > { %v1653_v12 = vadd.f32 %v1646_v8, %v1627_v10  ;;  %v1628_v19 = vadd.f32 %v1612_v15, %v1339_v11  ;;  %v3967_v51 = vmax.f32 %v1652_v17, 0.0  ;;  %v1667_v53 = vrot.slane %v3969_v9, 7  ;;  %v3503_v11 = vld [vmem:[#allocation2 + $0x544] ss:$8 sps:$4 sm:$0xff]  }
 0x2e7   : > { %v1616_v22 = vpop.f32.mrf.mxu0 }
 0x2e8   : > { %v1654_v48 = vadd.f32 %v1650_v3, %v1628_v19  ;;  %v3965_v62 = vmax.f32 %v1653_v12, 0.0  ;;  %v1629_v27 = vadd.f32 %v1616_v22, %v1343_v55  ;;  %v1668_v54 = vrot.slane %v3967_v51, 7  ;;  %v3498_v19 = vld [vmem:[%s4173_s4 + $0x70] ss:$8 sps:$4 sm:$0xff]  }
 0x2e9   : > { %v1618_v13 = vpop.f32.mrf.mxu0  ;;  %v2192_v56 = vrot.slane %v3967_v51, 1 }
 0x2ea   : > { %v1662_v4 = vmax.f32 %v1654_v48, 0.0  ;;  %v1630_v16 = vadd.f32 %v1618_v13, %v1345_v21  ;;  %v1728_v35 = vpack.c.bf16 %v3965_v62, %v3969_v9  ;;  %v1655_v40 = vadd.f32 %v1646_v8, %v1629_v27  ;;  %v3509_v13 = vld [vmem:[#allocation2 + $0x534] ss:$8 sps:$4 sm:$0xff]  }
 0x2eb   : > { %v1620_v25 = vpop.f32.mrf.mxu0  ;;  %v1669_v57 = vrot.slane %v3965_v62, 7 }
 0x2ec   : > { %v1631_v28 = vadd.f32 %v1620_v25, %v1347_v7  ;;  %v1656_v29 = vadd.f32 %v1650_v3, %v1630_v16  ;;  %v1729_v33 = vpack.c.bf16 %v1662_v4, %v3967_v51  ;;  %v1670_v44 = vrot.slane %v1662_v4, 7  ;;  %v3504_v7 = vld [vmem:[%s4173_s4 + $0x60] ss:$8 sps:$4 sm:$0xff]   ;;  %v3512_v16 = vld [vmem:[%s4173_s4 + $0x54] ss:$8 sps:$4 sm:$0xff]  }
 0x2ed   : > { %v1622_v30 = vpop.f32.mrf.mxu0  ;;  %v2194_v45 = vrot.slane %v1662_v4, 1  ;;  %v3986_v58 = vmax.f32 %v1655_v40, 0.0  ;;  %v1679_v17 = vsel %vm409_vm2, %v1667_v53, %v1669_v57  ;;  %v3507_v4 = vld [vmem:[#allocation2 + $0x530] ss:$8 sps:$4 sm:$0xff]   ;;  %v3515_v25 = vld [vmem:[#allocation2 + $0x524] ss:$8 sps:$4 sm:$0xff]  }
 0x2ee   : > { %v1657_v36 = vadd.f32 %v1646_v8, %v1631_v28  ;;  %v1632_v37 = vadd.f32 %v1622_v30, %v1349_v26  ;;  %v3974_v39 = vmax.f32 %v1656_v29, 0.0  ;;  %1957 = vmatprep.mubr.bf16.mxu1 %v1729_v33  ;;  %v1680_v5 = vsel %vm409_vm2, %v1668_v54, %v1670_v44  ;;  %v3510_v26 = vld [vmem:[%s4173_s4 + $0x50] ss:$8 sps:$4 sm:$0xff]   ;;  %v3513_v29 = vld [vmem:[#allocation2 + $0x520] ss:$8 sps:$4 sm:$0xff]  }
 0x2ef   : > { %1958 = vmatmul.mubr.bf16.vlgmr.msra.gmra.mxu1 %v1728_v35  ;;  %v1671_v55 = vrot.slane %v3986_v58, 7  ;;  %v3518_v30 = vld [vmem:[%s4173_s4 + $0x44] ss:$8 sps:$4 sm:$0xff]   ;;  %v3521_v33 = vld [vmem:[#allocation2 + $0x514] ss:$8 sps:$4 sm:$0xff]  }
 0x2f0   : > { %v3976_v42 = vmax.f32 %v1657_v36, 0.0  ;;  %v1658_v43 = vadd.f32 %v1650_v3, %v1632_v37  ;;  %v2196_v46 = vrot.slane %v3974_v39, 1  ;;  %2413 = vmatpush1.bf16.msra.mxu1 %v3483_v34  ;;  %v1672_v1 = vrot.slane %v3974_v39, 7  ;;  %v3516_v34 = vld [vmem:[%s4173_s4 + $0x40] ss:$8 sps:$4 sm:$0xff]  }
 0x2f1   : > { %2414 = vmatprep.subr.bf16.mxu1 %v3491_v38  ;;  %v2204_v3 = vsel %vm654_vm4, %v2192_v56, %v2194_v45  ;;  %v1677_v27 = vsel %vm409_vm2, %v1669_v57, %v1671_v55  ;;  %v3519_v35 = vld [vmem:[#allocation2 + $0x510] ss:$8 sps:$4 sm:$0xff]   ;;  %v3524_v36 = vld [vmem:[%s4173_s4 + $0x34] ss:$8 sps:$4 sm:$0xff]   ;;  %v3527_v37 = vld [vmem:[#allocation2 + $0x504] ss:$8 sps:$4 sm:$0xff]  }
 0x2f2   : > { %v1673_v49 = vrot.slane %v3976_v42, 7  ;;  %v3980_v50 = vmax.f32 %v1658_v43, 0.0  ;;  %v2202_v63 = vsel %vm654_vm4, %v2194_v45, %v2196_v46  ;;  %v1730_v8 = vpack.c.bf16 %v3976_v42, %v3986_v58  ;;  %v3522_v38 = vld [vmem:[%s4173_s4 + $0x30] ss:$8 sps:$4 sm:$0xff]   ;;  %v3530_v40 = vld [vmem:[%s4173_s4 + $0x24] ss:$8 sps:$4 sm:$0xff]  }
 0x2f3   : > { %v2216_v14 = vpack.c.bf16 %v2202_v63, %v2204_v3  ;;  %v1678_v21 = vsel %vm409_vm2, %v1670_v44, %v1672_v1  ;;  %v3533_v43 = vld [vmem:[#allocation2 + $0x5f4] ss:$8 sps:$4 sm:$0xff]   ;;  %v3528_v44 = vld [vmem:[%s4173_s4 + $0x20] ss:$8 sps:$4 sm:$0xff]   ;;  %v3531_v45 = vld [vmem:[#allocation2 + $0x5f0] ss:$8 sps:$4 sm:$0xff]  }
 0x2f4   : > { %v1674_v59 = vrot.slane %v3980_v50, 7  ;;  %v1731_v61 = vpack.c.bf16 %v3980_v50, %v3974_v39  ;;  %2415 = vmatpush1.bf16.msra.mxu1 %v3489_v47  ;;  %v1681_v6 = vsel %vm409_vm2, %v1673_v49, %v1667_v53  ;;  %v1675_v32 = vsel %vm409_vm2, %v1671_v55, %v1673_v49  ;;  %v3536_v47 = vld [vmem:[%s4173_s4 + $0x14] ss:$8 sps:$4 sm:$0xff]   ;;  %v3539_v49 = vld [vmem:[#allocation2 + $0x5e4] ss:$8 sps:$4 sm:$0xff]  }
 0x2f5   : > { %2416 = vmatprep.subr.bf16.mxu1 %v3497_v52  ;;  %v3101_v22 = vpack.c.bf16 %v1679_v17, %v1681_v6  ;;  %v1693_v28 = vpack.c.bf16 %v1675_v32, %v1677_v27  ;;  %v3534_v52 = vld [vmem:[%s4173_s4 + $0x10] ss:$8 sps:$4 sm:$0xff]   ;;  %v3537_v53 = vld [vmem:[#allocation2 + $0x5e0] ss:$8 sps:$4 sm:$0xff]   ;;  %v3545_v57 = vld [vmem:[#allocation2 + $0x5d4] ss:$8 sps:$4 sm:$0xff]  }
 0x2f6   : > { %1967 = vmatprep.mubr.bf16.mxu1 %v1731_v61  ;;  %v1682_v10 = vsel %vm409_vm2, %v1674_v59, %v1668_v54  ;;  %v1676_v12 = vsel %vm409_vm2, %v1672_v1, %v1674_v59  ;;  %v3542_v54 = vld [vmem:[%s4173_s4 + $0x4] ss:$8 sps:$4 sm:$0xff]   ;;  %v3540_v59 = vld [vmem:[%s4173_s4] ss:$8 sps:$4 sm:$0xff]   ;;  %v3543_v61 = vld [vmem:[#allocation2 + $0x5d0] ss:$8 sps:$4 sm:$0xff]  }
 0x2f7   : > { %v3097_v15 = vpack.c.bf16 %v1680_v5, %v1682_v10  ;;  %1968 = vmatmul.mubr.bf16.gmra.mxu1 %v1730_v8  ;;  %v1694_v48 = vpack.c.bf16 %v1676_v12, %v1678_v21  ;;  %v3548_v63 = vld [vmem:[%s4173_s4 + $0xf4] ss:$8 sps:$4 sm:$0xff]   ;;  %v3551_v1 = vld [vmem:[#allocation2 + $0x5c4] ss:$8 sps:$4 sm:$0xff]   ;;  %v3549_v3 = vld [vmem:[#allocation2 + $0x5c0] ss:$8 sps:$4 sm:$0xff]  }
 0x2f8   : > { %2417 = vmatpush1.bf16.msra.mxu1 %v3495_v2  ;;  %2444 = vmatprep.mubr.bf16.mxu1 %v2216_v14  ;;  %v3546_v2 = vld [vmem:[%s4173_s4 + $0xf0] ss:$8 sps:$4 sm:$0xff]   ;;  %v3554_v5 = vld [vmem:[%s4173_s4 + $0xe4] ss:$8 sps:$4 sm:$0xff]   ;;  %v3557_v6 = vld [vmem:[#allocation2 + $0x5b4] ss:$8 sps:$4 sm:$0xff]  }
 0x2f9   : > { %3098 = vmatprep.mubr.msk.bf16.mxu0 %vm3906_vm8, %v3097_v15  ;;  %2418 = vmatprep.subr.bf16.mxu1 %v3503_v11  ;;  %v3552_v8 = vld [vmem:[%s4173_s4 + $0xe0] ss:$8 sps:$4 sm:$0xff]   ;;  %v3555_v10 = vld [vmem:[#allocation2 + $0x5b0] ss:$8 sps:$4 sm:$0xff]   ;;  %v3560_v11 = vld [vmem:[%s4173_s4 + $0xd4] ss:$8 sps:$4 sm:$0xff]  }
 0x2fa   : > { %3102 = vmatmul.mubr.msk.bf16.vlgmr.msra.gmra.mxu0 %vm3906_vm8, %v3101_v22  ;;  %v3563_v14 = vld [vmem:[#allocation2 + $0x5a4] ss:$8 sps:$4 sm:$0xff]   ;;  %v3558_v15 = vld [vmem:[%s4173_s4 + $0xd0] ss:$8 sps:$4 sm:$0xff]   ;;  %v3561_v12 = vld [vmem:[#allocation2 + $0x5a0] ss:$8 sps:$4 sm:$0xff]  }
 0x2fb   : > { %2710 = vmatpush1.bf16.msra.mxu0 %v3498_v19  ;;  %2180 = vmatprep.mubr.bf16.mxu0 %v1694_v48  ;;  %v3566_v17 = vld [vmem:[%s4173_s4 + $0xc4] ss:$8 sps:$4 sm:$0xff]   ;;  %v3569_v19 = vld [vmem:[#allocation2 + $0x594] ss:$8 sps:$4 sm:$0xff]   ;;  %v3564_v22 = vld [vmem:[%s4173_s4 + $0xc0] ss:$8 sps:$4 sm:$0xff]  }
 0x2fc   : > { %2419 = vmatpush1.bf16.msra.mxu1 %v3501_v23  ;;  %2711 = vmatprep.subr.bf16.mxu0 %v3506_v18  ;;  %v3567_v23 = vld [vmem:[#allocation2 + $0x590] ss:$8 sps:$4 sm:$0xff]   ;;  %v3572_v21 = vld [vmem:[%s4173_s4 + $0xb4] ss:$8 sps:$4 sm:$0xff]   ;;  %v3575_v18 = vld [vmem:[#allocation2 + $0x584] ss:$8 sps:$4 sm:$0xff]  }
 0x2fd   : > { %2420 = vmatprep.subr.bf16.mxu1 %v3509_v13  ;;  %v2195_v48 = vrot.slane %v3986_v58, 1  ;;  %v2198_v13 = vrot.slane %v3980_v50, 1  ;;  %v3570_v55 = vld [vmem:[%s4173_s4 + $0xb0] ss:$8 sps:$4 sm:$0xff]   ;;  %v2191_v32 = vrot.slane %v3969_v9, 1  ;;  %v2197_v39 = vrot.slane %v3976_v42, 1 }
 0x2fe   : > { %v3576_v58 = vld [vmem:[%s4173_s4 + $0xa0] ss:$8 sps:$4 sm:$0xff]   ;;  %v3579_v51 = vld [vmem:[%s4173_s4 + $0x90] ss:$8 sps:$4 sm:$0xff]  }
 0x2ff   : > { %2712 = vmatpush1.bf16.msra.mxu0 %v3504_v7  ;;  %v2193_v7 = vrot.slane %v3965_v62, 1  ;;  %v2200_v62 = vsel %vm654_vm4, %v2196_v46, %v2198_v13  ;;  %v3584_v46 = vld [vmem:[%s4173_s4 + $0x84] ss:$8 sps:$4 sm:$0xff]   ;;  %v2205_v42 = vsel %vm654_vm4, %v2197_v39, %v2191_v32 }
 0x300   : > { %2421 = vmatpush1.bf16.msra.mxu1 %v3507_v4  ;;  %2713 = vmatprep.subr.bf16.mxu0 %v3512_v16  ;;  %v3573_v4 = vld [vmem:[#allocation2 + $0x580] ss:$8 sps:$4 sm:$0xff]   ;;  %v3578_v16 = vld [vmem:[%s4173_s4 + $0xa4] ss:$8 sps:$4 sm:$0xff]  }
 0x301   : > { %2422 = vmatprep.subr.bf16.mxu1 %v3515_v25  ;;  %v2201_v50 = vsel %vm654_vm4, %v2193_v7, %v2195_v48  ;;  %v2206_v25 = vsel %vm654_vm4, %v2198_v13, %v2192_v56  ;;  %v2203_v9 = vsel %vm654_vm4, %v2191_v32, %v2193_v7  ;;  %v2199_v56 = vsel %vm654_vm4, %v2195_v48, %v2197_v39 }
 0x302   : > { %2181 = vmatmul.mubr.bf16.gmra.mxu0 %v1693_v28  ;;  %v2215_v27 = vpack.c.bf16 %v2201_v50, %v2203_v9  ;;  %v3137_v28 = vpack.c.bf16 %v2206_v25, %v2200_v62 }
 0x303   : > { %2714 = vmatpush1.bf16.msra.mxu0 %v3510_v26  ;;  %2741 = vmatprep.mubr.bf16.mxu0 %v3856_v60  ;;  %v3525_v60 = vld [vmem:[#allocation2 + $0x500] ss:$8 sps:$4 sm:$0xff]   ;;  %v3581_v26 = vld [vmem:[%s4173_s4 + $0x94] ss:$8 sps:$4 sm:$0xff]  }
 0x304   : > { %2423 = vmatpush1.bf16.msra.mxu1 %v3513_v29  ;;  %2715 = vmatprep.subr.bf16.mxu0 %v3518_v30  ;;  %v3582_v29 = vld [vmem:[%s4173_s4 + $0x80] ss:$8 sps:$4 sm:$0xff]   ;;  %v3141_v30 = vpack.c.bf16 %v2205_v42, %v2199_v56 }
 0x305   : > { %2424 = vmatprep.subr.bf16.mxu1 %v3521_v33 }
 0x307   : > { %2716 = vmatpush1.bf16.msra.mxu0 %v3516_v34 }
 0x308   : > { %2425 = vmatpush1.bf16.msra.mxu1 %v3519_v35  ;;  %2717 = vmatprep.subr.bf16.mxu0 %v3524_v36 }
 0x309   : > { %2426 = vmatprep.subr.bf16.mxu1 %v3527_v37 }
 0x30b   : > { %2718 = vmatpush1.bf16.msra.mxu0 %v3522_v38 }
 0x30c   : > { %2427 = vmatpush1.bf16.msra.mxu1 %v3525_v60  ;;  %2719 = vmatprep.subr.bf16.mxu0 %v3530_v40 }
 0x30d   : > { %2428 = vmatprep.subr.bf16.mxu1 %v3533_v43 }
 0x30f   : > { %2720 = vmatpush1.bf16.msra.mxu0 %v3528_v44 }
 0x310   : > { %2429 = vmatpush2.bf16.msra.mxu1 %v3531_v45  ;;  %2721 = vmatprep.subr.bf16.mxu0 %v3536_v47 }
 0x311   : > { %2430 = vmatprep.subr.bf16.mxu1 %v3539_v49 }
 0x313   : > { %2722 = vmatpush1.bf16.msra.mxu0 %v3534_v52 }
 0x314   : > { %2431 = vmatpush2.bf16.msra.mxu1 %v3537_v53  ;;  %2723 = vmatprep.subr.bf16.mxu0 %v3542_v54  ;;  %v2479_v53 = vsub.s32 6, %v3751_v31  ;;  %v2537_v54 = vsub.s32 7, %v3751_v31 }
 0x315   : > { %2432 = vmatprep.subr.bf16.mxu1 %v3545_v57  ;;  %v3585_v57 = vld [vmem:[%s4174_s5] sm:$0xff] }
 0x317   : > { %2724 = vmatpush1.bf16.msra.mxu0 %v3540_v59 }
 0x318   : > { %2433 = vmatpush2.bf16.msra.mxu1 %v3543_v61  ;;  %2725 = vmatprep.subr.bf16.mxu0 %v3548_v63 }
 0x319   : > { %2434 = vmatprep.subr.bf16.mxu1 %v3551_v1 }
 0x31b   : > { %2726 = vmatpush2.bf16.msra.mxu0 %v3546_v2 }
 0x31c   : > { %2435 = vmatpush2.bf16.msra.mxu1 %v3549_v3  ;;  %2727 = vmatprep.subr.bf16.mxu0 %v3554_v5  ;;  %v2480_v3 = vrot.slane %v3585_v57, %v2479_v53 }
 0x31d   : > { %2436 = vmatprep.subr.bf16.mxu1 %v3557_v6  ;;  %v2538_v6 = vrot.slane %v3585_v57, %v2537_v54 }
 0x31f   : > { %2728 = vmatpush2.bf16.msra.mxu0 %v3552_v8 }
 0x320   : > { %2437 = vmatpush2.bf16.msra.mxu1 %v3555_v10  ;;  %2729 = vmatprep.subr.bf16.mxu0 %v3560_v11 }
 0x321   : > { %2438 = vmatprep.subr.bf16.mxu1 %v3563_v14 }
 0x323   : > { %2730 = vmatpush2.bf16.msra.mxu0 %v3558_v15 }
 0x324   : > { %2439 = vmatpush2.bf16.msra.mxu1 %v3561_v12  ;;  %2731 = vmatprep.subr.bf16.mxu0 %v3566_v17 }
 0x325   : > { %2440 = vmatprep.subr.bf16.mxu1 %v3569_v19 }
 0x327   : > { %2732 = vmatpush2.bf16.msra.mxu0 %v3564_v22 }
 0x328   : > { %2441 = vmatpush2.bf16.msra.mxu1 %v3567_v23  ;;  %2733 = vmatprep.subr.bf16.mxu0 %v3572_v21 }
 0x329   : > { %2442 = vmatprep.subr.bf16.mxu1 %v3575_v18 }
 0x32b   : > { %2734 = vmatpush2.bf16.msra.mxu0 %v3570_v55 }
 0x32c   : > { %2443 = vmatpush2.bf16.msra.mxu1 %v3573_v4  ;;  %2735 = vmatprep.subr.bf16.mxu0 %v3578_v16 }
 0x32f   : > { %2445 = vmatmul.mubr.bf16.vlgmr.msra.gmra.mxu1 %v2215_v27  ;;  %2736 = vmatpush2.bf16.msra.mxu0 %v3576_v58 }
 0x330   : > { %3138 = vmatprep.mubr.msk.bf16.mxu1 %vm3945_vm10, %v3137_v28  ;;  %2737 = vmatprep.subr.bf16.mxu0 %v3581_v26 }
 0x333   : > { %2738 = vmatpush2.bf16.msra.mxu0 %v3579_v51 }
 0x334   : > { %2739 = vmatprep.subr.bf16.mxu0 %v3584_v46 }
 0x337   : > { %3142 = vmatmul.mubr.msk.bf16.gmra.mxu1 %vm3945_vm10, %v3141_v30  ;;  %2740 = vmatpush2.bf16.msra.mxu0 %v3582_v29 }
 0x33a   : > { %2742 = vmatmul.mubr.bf16.vlgmr.msra.gmra.mxu0 %v3862_v0  ;;  %v2475_v0 = vsub.s32 2, %v3751_v31 }
 0x33b   : > { %2751 = vmatprep.mubr.bf16.mxu0 %v3881_v20  ;;  %v2533_v20 = vsub.s32 3, %v3751_v31 }
 0x33c   : > { %v2476_v59 = vrot.slane %v3585_v57, %v2475_v0  ;;  %v2490_v19 = vrot.slane %v2480_v3, %v2475_v0 }
 0x33d   : > { %v2534_v63 = vrot.slane %v3585_v57, %v2533_v20  ;;  %v2548_v22 = vrot.slane %v2538_v6, %v2533_v20 }
 0x33e   : > { %v2486_v11 = vrot.slane %v2476_v59, %v2475_v0 }
 0x33f   : > { %v2544_v15 = vrot.slane %v2534_v63, %v2533_v20 }
 0x342   : > { %2752 = vmatmul.mubr.bf16.gmra.mxu0 %v3901_v41 }
 0x3af   : > { %v1959_v33 = vpop.f32.mrf.mxu1 }
 0x3b1   : > { %v1961_v34 = vpop.f32.mrf.mxu1 }
 0x3b3   : > { %v1963_v35 = vpop.f32.mrf.mxu1 }
 0x3b5   : > { %v1965_v37 = vpop.f32.mrf.mxu1 }
 0x3b7   : > { %v1969_v60 = vpop.f32.mrf.mxu1 }
 0x3b9   : > { %v1971_v43 = vpop.f32.mrf.mxu1 }
 0x3ba   : > { %v2172_v36 = vpop.f32.mrf.mxu0 }
 0x3bb   : > { %v1973_v24 = vpop.f32.mrf.mxu1  ;;  %v2173_v2 = vadd.f32 %v2172_v36, %v1959_v33 }
 0x3bc   : > { %v2174_v38 = vpop.f32.mrf.mxu0 }
 0x3bd   : > { %v1975_v47 = vpop.f32.mrf.mxu1  ;;  %v2175_v8 = vadd.f32 %v2174_v38, %v1961_v34 }
 0x3be   : > { %v2176_v40 = vpop.f32.mrf.mxu0 }
 0x3bf   : > { %v2177_v12 = vadd.f32 %v2176_v40, %v1963_v35 }
 0x3c0   : > { %v2178_v44 = vpop.f32.mrf.mxu0 }
 0x3c1   : > { %v2179_v18 = vadd.f32 %v2178_v44, %v1965_v37 }
 0x3c2   : > { %v2182_v45 = vpop.f32.mrf.mxu0 }
 0x3c3   : > { %v2183_v7 = vadd.f32 %v2182_v45, %v1969_v60 }
 0x3c4   : > { %v2184_v41 = vpop.f32.mrf.mxu0 }
 0x3c5   : > { %v2185_v62 = vadd.f32 %v2184_v41, %v1971_v43 }
 0x3c6   : > { %v2186_v1 = vpop.f32.mrf.mxu0 }
 0x3c7   : > { %v2187_v46 = vadd.f32 %v2186_v1, %v1973_v24 }
 0x3c8   : > { %v2188_v31 = vpop.f32.mrf.mxu0 }
 0x3c9   : > { %v2189_v35 = vadd.f32 %v2188_v31, %v1975_v47 }
 0x3ef   : > { %v2446_v49 = vpop.f32.mrf.mxu1 }
 0x3f0   : > { %v2465_v10 = vadd.f32 %v2446_v49, %v2173_v2 }
 0x3f1   : > { %v2448_v52 = vpop.f32.mrf.mxu1 }
 0x3f2   : > { %v2466_v17 = vadd.f32 %v2448_v52, %v2175_v8  ;;  %v2491_v48 = vadd.f32 %v2486_v11, %v2465_v10 }
 0x3f3   : > { %v2450_v61 = vpop.f32.mrf.mxu1 }
 0x3f4   : > { %v2467_v13 = vadd.f32 %v2450_v61, %v2177_v12  ;;  %v2492_v16 = vadd.f32 %v2490_v19, %v2466_v17 }
 0x3f5   : > { %v2452_v5 = vpop.f32.mrf.mxu1 }
 0x3f6   : > { %v2468_v32 = vadd.f32 %v2452_v5, %v2179_v18  ;;  %v2493_v27 = vadd.f32 %v2486_v11, %v2467_v13 }
 0x3f7   : > { %v2456_v14 = vpop.f32.mrf.mxu1 }
 0x3f8   : > { %v2469_v25 = vadd.f32 %v2456_v14, %v2183_v7  ;;  %v2494_v29 = vadd.f32 %v2490_v19, %v2468_v32 }
 0x3f9   : > { %v2458_v23 = vpop.f32.mrf.mxu1 }
 0x3fa   : > { %v2743_v21 = vpop.f32.mrf.mxu0  ;;  %v2470_v56 = vadd.f32 %v2458_v23, %v2185_v62  ;;  %v2495_v36 = vadd.f32 %v2486_v11, %v2469_v25 }
 0x3fb   : > { %v2744_v55 = vadd.f32 %v2743_v21, %v2544_v15  ;;  %v2460_v9 = vpop.f32.mrf.mxu1 }
 0x3fc   : > { %v2745_v4 = vpop.f32.mrf.mxu0  ;;  %v2471_v60 = vadd.f32 %v2460_v9, %v2187_v46  ;;  %v2496_v24 = vadd.f32 %v2490_v19, %v2470_v56 }
 0x3fd   : > { %v2762_v50 = vadd.f32 %v2744_v55, %v2491_v48  ;;  %v2746_v58 = vadd.f32 %v2745_v4, %v2548_v22  ;;  %v2462_v37 = vpop.f32.mrf.mxu1 }
 0x3fe   : > { %v2747_v26 = vpop.f32.mrf.mxu0  ;;  %v2472_v49 = vadd.f32 %v2462_v37, %v2189_v35  ;;  %v2497_v52 = vadd.f32 %v2486_v11, %v2471_v60 }
 0x3ff   : > { %v2770_v39 = vmax.f32 %v2762_v50, 0.0  ;;  %v2763_v28 = vadd.f32 %v2746_v58, %v2492_v16  ;;  %v2748_v51 = vadd.f32 %v2747_v26, %v2544_v15 }
 0x400   : > { %v2749_v42 = vpop.f32.mrf.mxu0  ;;  %v2498_v61 = vadd.f32 %v2490_v19, %v2472_v49 }
 0x401   : > { %2778 = vst [vmem:[%s4156_s27] sm:$0xff] %v2770_v39  ;;  %v2771_v30 = vmax.f32 %v2763_v28, 0.0  ;;  %v2764_v33 = vadd.f32 %v2748_v51, %v2493_v27  ;;  %v2750_v34 = vadd.f32 %v2749_v42, %v2548_v22 }
 0x402   : > { %v2753_v38 = vpop.f32.mrf.mxu0 }
 0x403   : > { %2779 = vst [vmem:[%s4156_s27 + $0x8] sm:$0xff] %v2771_v30  ;;  %v2772_v40 = vmax.f32 %v2764_v33, 0.0  ;;  %v2765_v43 = vadd.f32 %v2750_v34, %v2494_v29  ;;  %v2754_v44 = vadd.f32 %v2753_v38, %v2544_v15 }
 0x404   : > { %v2755_v45 = vpop.f32.mrf.mxu0 }
 0x405   : > { %2780 = vst [vmem:[%s4156_s27 + $0x10] sm:$0xff] %v2772_v40  ;;  %v2773_v0 = vmax.f32 %v2765_v43, 0.0  ;;  %v2766_v20 = vadd.f32 %v2754_v44, %v2495_v36  ;;  %v2756_v41 = vadd.f32 %v2755_v45, %v2548_v22 }
 0x406   : > { %v2757_v47 = vpop.f32.mrf.mxu0 }
 0x407   : > { %2781 = vst [vmem:[%s4156_s27 + $0x18] sm:$0xff] %v2773_v0  ;;  %v2774_v53 = vmax.f32 %v2766_v20, 0.0  ;;  %v2767_v54 = vadd.f32 %v2756_v41, %v2496_v24  ;;  %v2758_v57 = vadd.f32 %v2757_v47, %v2544_v15 }
 0x408   : > { %v2759_v59 = vpop.f32.mrf.mxu0 }
 0x409   : > { %2782 = vst [vmem:[%s4156_s27 + $0x20] sm:$0xff] %v2774_v53  ;;  %v2775_v63 = vmax.f32 %v2767_v54, 0.0  ;;  %v2768_v1 = vadd.f32 %v2758_v57, %v2497_v52  ;;  %v2760_v2 = vadd.f32 %v2759_v59, %v2548_v22 }
 0x40b   : > { %2783 = vst [vmem:[%s4156_s27 + $0x28] sm:$0xff] %v2775_v63  ;;  %v2776_v3 = vmax.f32 %v2768_v1, 0.0  ;;  %v2769_v5 = vadd.f32 %v2760_v2, %v2498_v61 }
 0x40d   : > { %2784 = vst [vmem:[%s4156_s27 + $0x30] sm:$0xff] %v2776_v3  ;;  %v2777_v6 = vmax.f32 %v2769_v5, 0.0 }
 0x40f   : > { %2785 = vst [vmem:[%s4156_s27 + $0x38] sm:$0xff] %v2777_v6 }
 0x410 PF: > { %s17_s21 = sadd.s32 1, %s3622_s21  }
 0x411   : > { %p14_p2 = scmp.ge.s32.totalorder %s17_s21, 4  }
 0x413   :  { %16 = sbr.rel (!%p14_p2) target bundleno = 1 (0x1), region = 86 }
 0x418   :  { %2810 = vsyncpa [#allocation3], 1 }
 0x419   :  { %2812 = vsyncpa [#allocation3 + $0x1], 1 }

</bundles_post_ra>
